<compile_context>
chip_gen: v6e
topology: v6e:2x2x1
jax: 0.10.0
libtpu: 0.0.40
codegen_flags: <defaults>
</compile_context>

<pallas_src>
import jax
import jax.numpy as jnp
from jax.experimental import pallas as pl
from jax.experimental.pallas import tpu as pltpu

IN_DIM = 500
HID_DIM = 500
OUT_DIM = 1

PAD_IN = 512    # 500 -> 512  (multiple of 128 lanes)
PAD_HID = 512
PAD_OUT = 128   # lane-dense output; only column 0 is the real logit

MAX_BATCH_TILE = 256


def _round_up(x, m):
    return (x + m - 1) // m * m


def _mlp_kernel(x_ref, w1_ref, b1_ref, w2_ref, b2_ref, w3_ref, b3_ref, o_ref):
    # Layer 1: bf16 MXU matmul, f32 accumulate; bias + ReLU in f32.
    h = jnp.dot(x_ref[...], w1_ref[...], preferred_element_type=jnp.float32)
    h = jnp.maximum(h + b1_ref[...], 0.0).astype(jnp.bfloat16)

    # Layer 2.
    h = jnp.dot(h, w2_ref[...], preferred_element_type=jnp.float32)
    h = jnp.maximum(h + b2_ref[...], 0.0).astype(jnp.bfloat16)

    # Layer 3: lane-dense padded output (128 cols, real logit in col 0).
    logit = jnp.dot(h, w3_ref[...], preferred_element_type=jnp.float32)
    logit = logit + b3_ref[...]
    o_ref[...] = jax.nn.sigmoid(logit)


def digits_discriminator(x, w1, b1, w2, b2, w3, b3):
    """x: (B, 500) float32.  Weights are (in, out) float32; biases (1, out)."""
    B = x.shape[0]

    # Batch tile: multiple of 8 sublanes, capped so tiles stay small in VMEM.
    tb = min(MAX_BATCH_TILE, max(8, _round_up(B, 8)))
    bp = _round_up(B, tb)

    # ---- zero-pad + cast in the wrapper (zero padding keeps the math exact) ----
    xp = jnp.zeros((bp, PAD_IN), jnp.bfloat16).at[:B, :IN_DIM].set(
        x.astype(jnp.bfloat16))
    w1p = jnp.zeros((PAD_IN, PAD_HID), jnp.bfloat16).at[:IN_DIM, :HID_DIM].set(
        w1.astype(jnp.bfloat16))
    w2p = jnp.zeros((PAD_HID, PAD_HID), jnp.bfloat16).at[:HID_DIM, :HID_DIM].set(
        w2.astype(jnp.bfloat16))
    w3p = jnp.zeros((PAD_HID, PAD_OUT), jnp.bfloat16).at[:HID_DIM, :OUT_DIM].set(
        w3.astype(jnp.bfloat16))
    b1p = jnp.zeros((1, PAD_HID), jnp.float32).at[:, :HID_DIM].set(b1)
    b2p = jnp.zeros((1, PAD_HID), jnp.float32).at[:, :HID_DIM].set(b2)
    b3p = jnp.zeros((1, PAD_OUT), jnp.float32).at[:, :OUT_DIM].set(b3)

    resident = lambda shape: pl.BlockSpec(shape, lambda i: (0, 0))

    flops = 2 * bp * (PAD_IN * PAD_HID + PAD_HID * PAD_HID + PAD_HID * PAD_OUT)
    bytes_accessed = (
        xp.size * 2 + w1p.size * 2 + w2p.size * 2 + w3p.size * 2
        + (b1p.size + b2p.size + b3p.size) * 4
        + bp * PAD_OUT * 4)

    out_padded = pl.pallas_call(
        _mlp_kernel,
        out_shape=jax.ShapeDtypeStruct((bp, PAD_OUT), jnp.float32),
        grid=(bp // tb,),
        in_specs=[
            pl.BlockSpec((tb, PAD_IN), lambda i: (i, 0)),   # x: tiled over batch
            resident((PAD_IN, PAD_HID)),                    # w1 (VMEM-resident)
            resident((1, PAD_HID)),                         # b1
            resident((PAD_HID, PAD_HID)),                   # w2
            resident((1, PAD_HID)),                         # b2
            resident((PAD_HID, PAD_OUT)),                   # w3
            resident((1, PAD_OUT)),                         # b3
        ],
        out_specs=pl.BlockSpec((tb, PAD_OUT), lambda i: (i, 0)),
        compiler_params=pltpu.CompilerParams(
            dimension_semantics=("parallel",),
            vmem_limit_bytes=32 << 20,
        ),
        cost_estimate=pl.CostEstimate(
            flops=flops,
            transcendentals=bp * PAD_OUT,
            bytes_accessed=bytes_accessed,
        ),
    )(xp, w1p, b1p, w2p, b2p, w3p, b3p)

    # Strip batch padding and the 127 dummy output lanes.
    return out_padded[:B, :OUT_DIM]


def init_params(key):
    """Deterministic init matching the PyTorch module's parameter shapes.

    PyTorch nn.Linear stores weight as (out, in); here we keep the transposed
    (in, out) layout so the kernel computes x @ W without an in-kernel transpose.
    """
    ks = jax.random.split(key, 6)

    def uniform_linear(kw, kb, fan_in, fan_out):
        bound = 1.0 / jnp.sqrt(jnp.float32(fan_in))
        w = jax.random.uniform(kw, (fan_in, fan_out), jnp.float32, -bound, bound)
        b = jax.random.uniform(kb, (1, fan_out), jnp.float32, -bound, bound)
        return w, b

    w1, b1 = uniform_linear(ks[0], ks[1], IN_DIM, HID_DIM)
    w2, b2 = uniform_linear(ks[2], ks[3], HID_DIM, HID_DIM)
    w3, b3 = uniform_linear(ks[4], ks[5], HID_DIM, OUT_DIM)
    return w1, b1, w2, b2, w3, b3


def reference_bf16(x, w1, b1, w2, b2, w3, b3):
    """Same math as the kernel (bf16 matmuls, f32 accumulate) outside Pallas."""
    bf = jnp.bfloat16
    h = jnp.dot(x.astype(bf), w1.astype(bf), preferred_element_type=jnp.float32)
    h = jnp.maximum(h + b1, 0.0).astype(bf)
    h = jnp.dot(h, w2.astype(bf), preferred_element_type=jnp.float32)
    h = jnp.maximum(h + b2, 0.0).astype(bf)
    logit = jnp.dot(h, w3.astype(bf), preferred_element_type=jnp.float32) + b3
    return jax.nn.sigmoid(logit)


def reference_f32(x, w1, b1, w2, b2, w3, b3):
    h = jnp.maximum(x @ w1 + b1, 0.0)
    h = jnp.maximum(h @ w2 + b2, 0.0)
    return jax.nn.sigmoid(h @ w3 + b3)


if __name__ == "__main__":
    key = jax.random.PRNGKey(0)
    k_x, k_p = jax.random.split(key)

    B = 8
    x = jax.random.normal(k_x, (B, IN_DIM), jnp.float32)
    params = init_params(k_p)

    out = digits_discriminator(x, *params)
    out = jax.block_until_ready(out)

    assert out.shape == (B, OUT_DIM)
    # Tight check against a reference that uses the same bf16/f32 mixed precision.
    ref_bf = reference_bf16(x, *params)
    assert jnp.allclose(out, ref_bf, atol=5e-3, rtol=5e-3)
    # Coarser semantic check against the full-f32 PyTorch-equivalent forward.
    ref_f32 = reference_f32(x, *params)
    assert jnp.allclose(out, ref_f32, atol=5e-2, rtol=5e-2)

    print("KERNEL_OK")
</pallas_src>

<mosaic_0001>
module attributes {stable_mosaic.version = 11 : i64} {
  func.func @_mlp_kernel(%arg0: i32, %arg1: memref<8x512xbf16, #tpu.memory_space<vmem>>, %arg2: memref<512x512xbf16, #tpu.memory_space<vmem>>, %arg3: memref<1x512xf32, #tpu.memory_space<vmem>>, %arg4: memref<512x512xbf16, #tpu.memory_space<vmem>>, %arg5: memref<1x512xf32, #tpu.memory_space<vmem>>, %arg6: memref<512x128xbf16, #tpu.memory_space<vmem>>, %arg7: memref<1x128xf32, #tpu.memory_space<vmem>>, %arg8: memref<8x128xf32, #tpu.memory_space<vmem>>) attributes {dimension_semantics = [#tpu.dimension_semantics<parallel>], iteration_bounds = array<i64: 1>, scalar_prefetch = 0 : i64, scratch_operands = 0 : i64, tpu.core_type = #tpu.core_type<tc>, window_params = [{transform_indices = @transform_0, window_bounds = array<i64: 8, 512>}, {pipeline_mode = #tpu.pipeline_mode<synchronous>, transform_indices = @transform_1, window_bounds = array<i64: 512, 512>}, {pipeline_mode = #tpu.pipeline_mode<synchronous>, transform_indices = @transform_2, window_bounds = array<i64: 1, 512>}, {pipeline_mode = #tpu.pipeline_mode<synchronous>, transform_indices = @transform_3, window_bounds = array<i64: 512, 512>}, {pipeline_mode = #tpu.pipeline_mode<synchronous>, transform_indices = @transform_4, window_bounds = array<i64: 1, 512>}, {pipeline_mode = #tpu.pipeline_mode<synchronous>, transform_indices = @transform_5, window_bounds = array<i64: 512, 128>}, {pipeline_mode = #tpu.pipeline_mode<synchronous>, transform_indices = @transform_6, window_bounds = array<i64: 1, 128>}, {transform_indices = @transform_7, window_bounds = array<i64: 8, 128>}]} {
    %c0 = arith.constant 0 : index
    %c0_0 = arith.constant 0 : index
    %0 = vector.load %arg1[%c0, %c0_0] : memref<8x512xbf16, #tpu.memory_space<vmem>>, vector<8x512xbf16>
    %c0_1 = arith.constant 0 : index
    %c0_2 = arith.constant 0 : index
    %1 = vector.load %arg2[%c0_1, %c0_2] : memref<512x512xbf16, #tpu.memory_space<vmem>>, vector<512x512xbf16>
    %cst = arith.constant dense<0.000000e+00> : vector<8x512xf32>
    %2 = tpu.matmul %0, %1, %cst {dimension_numbers = #tpu.dot_dimension_numbers<[1], [0], [0], [1], [0, 0, 1, 1], [], []>} : vector<8x512xbf16>, vector<512x512xbf16>, vector<8x512xf32> -> vector<8x512xf32>
    %c0_3 = arith.constant 0 : index
    %c0_4 = arith.constant 0 : index
    %3 = vector.load %arg3[%c0_3, %c0_4] : memref<1x512xf32, #tpu.memory_space<vmem>>, vector<1x512xf32>
    %4 = vector.broadcast %3 : vector<1x512xf32> to vector<8x512xf32>
    %5 = arith.addf %2, %4 : vector<8x512xf32>
    %cst_5 = arith.constant 0.000000e+00 : f32
    %6 = vector.broadcast %cst_5 : f32 to vector<8x512xf32>
    %7 = arith.maximumf %5, %6 : vector<8x512xf32>
    %8 = arith.truncf %7 : vector<8x512xf32> to vector<8x512xbf16>
    %c0_6 = arith.constant 0 : index
    %c0_7 = arith.constant 0 : index
    %9 = vector.load %arg4[%c0_6, %c0_7] : memref<512x512xbf16, #tpu.memory_space<vmem>>, vector<512x512xbf16>
    %cst_8 = arith.constant dense<0.000000e+00> : vector<8x512xf32>
    %10 = tpu.matmul %8, %9, %cst_8 {dimension_numbers = #tpu.dot_dimension_numbers<[1], [0], [0], [1], [0, 0, 1, 1], [], []>} : vector<8x512xbf16>, vector<512x512xbf16>, vector<8x512xf32> -> vector<8x512xf32>
    %c0_9 = arith.constant 0 : index
    %c0_10 = arith.constant 0 : index
    %11 = vector.load %arg5[%c0_9, %c0_10] : memref<1x512xf32, #tpu.memory_space<vmem>>, vector<1x512xf32>
    %12 = vector.broadcast %11 : vector<1x512xf32> to vector<8x512xf32>
    %13 = arith.addf %10, %12 : vector<8x512xf32>
    %cst_11 = arith.constant 0.000000e+00 : f32
    %14 = vector.broadcast %cst_11 : f32 to vector<8x512xf32>
    %15 = arith.maximumf %13, %14 : vector<8x512xf32>
    %16 = arith.truncf %15 : vector<8x512xf32> to vector<8x512xbf16>
    %c0_12 = arith.constant 0 : index
    %c0_13 = arith.constant 0 : index
    %17 = vector.load %arg6[%c0_12, %c0_13] : memref<512x128xbf16, #tpu.memory_space<vmem>>, vector<512x128xbf16>
    %cst_14 = arith.constant dense<0.000000e+00> : vector<8x128xf32>
    %18 = tpu.matmul %16, %17, %cst_14 {dimension_numbers = #tpu.dot_dimension_numbers<[1], [0], [0], [1], [0, 0, 1, 1], [], []>} : vector<8x512xbf16>, vector<512x128xbf16>, vector<8x128xf32> -> vector<8x128xf32>
    %c0_15 = arith.constant 0 : index
    %c0_16 = arith.constant 0 : index
    %19 = vector.load %arg7[%c0_15, %c0_16] : memref<1x128xf32, #tpu.memory_space<vmem>>, vector<1x128xf32>
    %20 = vector.broadcast %19 : vector<1x128xf32> to vector<8x128xf32>
    %21 = arith.addf %18, %20 : vector<8x128xf32>
    %22 = arith.negf %21 : vector<8x128xf32>
    %23 = math.exp %22 : vector<8x128xf32>
    %cst_17 = arith.constant 1.000000e+00 : f32
    %24 = vector.broadcast %cst_17 : f32 to vector<8x128xf32>
    %25 = arith.addf %24, %23 : vector<8x128xf32>
    %26 = arith.divf %24, %25 : vector<8x128xf32>
    %c0_18 = arith.constant 0 : index
    %c0_19 = arith.constant 0 : index
    %27 = vector.load %arg8[%c0_18, %c0_19] : memref<8x128xf32, #tpu.memory_space<vmem>>, vector<8x128xf32>
    tpu.vector_store %arg8[%c0_18, %c0_19], %26 {strides = array<i32>} : memref<8x128xf32, #tpu.memory_space<vmem>>, vector<8x128xf32>,
    return
  }
  func.func @transform_0(%arg0: i32) -> (i32, i32) {
    %c0_i32 = arith.constant 0 : i32
    %c0_i32_0 = arith.constant 0 : i32
    return %arg0, %c0_i32 : i32, i32
  }
  func.func @transform_1(%arg0: i32) -> (i32, i32) {
    %c0_i32 = arith.constant 0 : i32
    %c0_i32_0 = arith.constant 0 : i32
    %c0_i32_1 = arith.constant 0 : i32
    return %c0_i32, %c0_i32_0 : i32, i32
  }
  func.func @transform_2(%arg0: i32) -> (i32, i32) {
    %c0_i32 = arith.constant 0 : i32
    %c0_i32_0 = arith.constant 0 : i32
    %c0_i32_1 = arith.constant 0 : i32
    return %c0_i32, %c0_i32_0 : i32, i32
  }
  func.func @transform_3(%arg0: i32) -> (i32, i32) {
    %c0_i32 = arith.constant 0 : i32
    %c0_i32_0 = arith.constant 0 : i32
    %c0_i32_1 = arith.constant 0 : i32
    return %c0_i32, %c0_i32_0 : i32, i32
  }
  func.func @transform_4(%arg0: i32) -> (i32, i32) {
    %c0_i32 = arith.constant 0 : i32
    %c0_i32_0 = arith.constant 0 : i32
    %c0_i32_1 = arith.constant 0 : i32
    return %c0_i32, %c0_i32_0 : i32, i32
  }
  func.func @transform_5(%arg0: i32) -> (i32, i32) {
    %c0_i32 = arith.constant 0 : i32
    %c0_i32_0 = arith.constant 0 : i32
    %c0_i32_1 = arith.constant 0 : i32
    return %c0_i32, %c0_i32_0 : i32, i32
  }
  func.func @transform_6(%arg0: i32) -> (i32, i32) {
    %c0_i32 = arith.constant 0 : i32
    %c0_i32_0 = arith.constant 0 : i32
    %c0_i32_1 = arith.constant 0 : i32
    return %c0_i32, %c0_i32_0 : i32, i32
  }
  func.func @transform_7(%arg0: i32) -> (i32, i32) {
    %c0_i32 = arith.constant 0 : i32
    %c0_i32_0 = arith.constant 0 : i32
    return %arg0, %c0_i32 : i32, i32
  }
}

</mosaic_0001>

<bundles_post_ra>
// kernel: tpu_custom_call.1
= control target key start
LH: loop header
LB: loop body
LE: loop exit
PB: predicated region body
PF: predicated region fallthrough
CT: control target
= control target key end

     0   :  { %12 = vsyncpa [#allocation3], 0  ;;  %s3421_s0 = inlined_call_operand.hbm [shape: bf16[8,512], index: 0, kind: input, shape index: {}]   ;;  %s3422_s1 = inlined_call_operand.hbm [shape: bf16[512,512], index: 1, kind: input, shape index: {}]   ;;  %s3423_s2 = inlined_call_operand.hbm [shape: f32[1,512], index: 2, kind: input, shape index: {}]   ;;  %s3424_s3 = inlined_call_operand.hbm [shape: bf16[512,512], index: 3, kind: input, shape index: {}]   ;;  %s3425_s4 = inlined_call_operand.vmem [shape: f32[1,512], index: 4, kind: input, shape index: {}]   ;;  %s3426_s5 = inlined_call_operand.hbm [shape: bf16[512,128], index: 5, kind: input, shape index: {}]   ;;  %s3427_s6 = inlined_call_operand.vmem [shape: f32[1,128], index: 6, kind: input, shape index: {}]   ;;  %s3428_s7 = inlined_call_operand.hbm [shape: f32[8,128], index: 7, kind: output, shape index: {}]  }
   0x1   :  { %13 = vsyncpa [#allocation6], 0 }
   0x2   :  { %14 = vsyncpa [#allocation9], 0 }
   0x3   :  { %15 = vsyncpa [#allocation4], 0  ;;  %s3299_s24 = smov [#allocation5]  }
   0x4   :  { %s31_s25 = sshll.u32 %s3299_s24, 4  ;;  %s32_s25 = int_to_ptr.vmem [resolvable:$true] %s31_s25 }
   0x5   :  { %s3179_s26 = scalar_lea.vmem %s32_s25, 16384  ;;  %p3184_p1 = scmp.lt.s32.totalorder %s32_s25, %s32_s25 }
   0x6   :  { %p3180_p0 = scmp.ne.s32.totalorder %s32_s25, %s3179_s26  ;;  %p3185_p2 = scmp.lt.s32.totalorder %s3179_s26, %s3179_s26 }
   0x8   :  { %p3186_p3 = por %p3185_p2, %p3184_p1 }
   0xa   :  { %p3187_p4 = pnand %p3186_p3, %p3180_p0 }
   0xc   :  { %3190 = shalt.err (!%p3187_p4)
}
   0xd   :  { %s3300_s27 = smov 256   ;;  %s3301_s28 = smov 16  }
   0xe   :  { %37 = dma.hbm_to_vmem [thread:$0]  %s3422_s1, 16384, %s32_s25, [#allocation6], %s3300_s27, %s3300_s27, %s3301_s28  }
   0xf   :  { %s3302_s8 = smov [#allocation8]   ;;  %s3303_s10 = smov [#allocation2]  }
  0x10   :  { %s53_s9 = sshll.u32 %s3302_s8, 4  ;;  %s22_s11 = sshll.u32 %s3303_s10, 4  ;;  %s54_s9 = int_to_ptr.vmem [resolvable:$true] %s53_s9  ;;  %s23_s11 = int_to_ptr.vmem [resolvable:$true] %s22_s11 }
  0x11   :  { %s3199_s12 = scalar_lea.vmem %s54_s9, 16384  ;;  %p3204_p6 = scmp.lt.s32.totalorder %s54_s9, %s54_s9 }
  0x12   :  { %p3200_p5 = scmp.ne.s32.totalorder %s54_s9, %s3199_s12  ;;  %p3205_p7 = scmp.lt.s32.totalorder %s3199_s12, %s3199_s12 }
  0x14   :  { %p3206_p8 = por %p3205_p7, %p3204_p6 }
  0x16   :  { %p3207_p9 = pnand %p3206_p8, %p3200_p5 }
  0x18   :  { %3210 = shalt.err (!%p3207_p9)
}
  0x19   :  { %59 = dma.hbm_to_vmem [thread:$0]  %s3424_s3, 16384, %s54_s9, [#allocation9], %s3300_s27, %s3300_s27, %s3301_s28  }
  0x1a   :  { %s3219_s15 = scalar_lea.vmem %s23_s11, 256  ;;  %p3224_p11 = scmp.lt.s32.totalorder %s23_s11, %s23_s11 }
  0x1b   :  { %p3220_p10 = scmp.ne.s32.totalorder %s23_s11, %s3219_s15  ;;  %p3225_p12 = scmp.lt.s32.totalorder %s3219_s15, %s3219_s15 }
  0x1d   :  { %p3226_p13 = por %p3225_p12, %p3224_p11 }
  0x1f   :  { %p3227_p0 = pnand %p3226_p13, %p3220_p10 }
  0x21   :  { %3230 = shalt.err (!%p3227_p0)
}
  0x22   :  { %25 = dma.hbm_to_vmem [thread:$0]  %s3421_s0, 256, %s23_s11, [#allocation3]  }
  0x23   :  { %s3304_s17 = smov [#allocation7]   ;;  %s3305_s19 = smov [#allocation10]  }
  0x24   :  { %s44_s18 = sshll.u32 %s3304_s17, 4  ;;  %s67_s20 = sshll.u32 %s3305_s19, 4  ;;  %s45_s18 = int_to_ptr.vmem [resolvable:$true] %s44_s18  ;;  %s68_s20 = int_to_ptr.vmem [resolvable:$true] %s67_s20 }
  0x25   :  { %s3239_s21 = scalar_lea.vmem %s45_s18, 64  ;;  %p3244_p2 = scmp.lt.s32.totalorder %s45_s18, %s45_s18 }
  0x26   :  { %p3240_p1 = scmp.ne.s32.totalorder %s45_s18, %s3239_s21  ;;  %p3245_p3 = scmp.lt.s32.totalorder %s3239_s21, %s3239_s21 }
  0x28   :  { %p3246_p4 = por %p3245_p3, %p3244_p2 }
  0x2a   :  { %p3247_p5 = pnand %p3246_p4, %p3240_p1 }
  0x2c   :  { %3250 = shalt.err (!%p3247_p5)
}
  0x2d   :  { %47 = dma.hbm_to_vmem [thread:$0]  %s3423_s2, 64, %s45_s18, [#allocation6]  }
  0x2e   :  { %s3259_s23 = scalar_lea.vmem %s68_s20, 4096  ;;  %p3264_p7 = scmp.lt.s32.totalorder %s68_s20, %s68_s20 }
  0x2f   :  { %p3260_p6 = scmp.ne.s32.totalorder %s68_s20, %s3259_s23  ;;  %p3265_p8 = scmp.lt.s32.totalorder %s3259_s23, %s3259_s23 }
  0x31   :  { %p3266_p9 = por %p3265_p8, %p3264_p7 }
  0x33   :  { %p3267_p10 = pnand %p3266_p9, %p3260_p6 }
  0x35   :  { %3270 = shalt.err (!%p3267_p10)
}
  0x36   :  { %s3306_s0 = smov 64   ;;  %s3307_s24 = smov 4  }
  0x37   :  { %73 = dma.hbm_to_vmem [thread:$0]  %s3426_s5, 4096, %s68_s20, [#allocation9], %s3306_s0, %s3306_s0, %s3307_s24  }
  0x38   :  { %3291 = dma.done.wait [#allocation3], 256  }
  0x39   :  { %3292 = vsyncadd [#allocation3], 4294967040 }
  0x3a   :  { %3293 = dma.done.wait [#allocation6], 16448  }
  0x3b   :  { %3294 = vsyncadd [#allocation6], 4294950848 }
  0x3c   :  { %3295 = dma.done.wait [#allocation9], 20480  }
  0x3d   :  { %3296 = vsyncadd [#allocation9], 4294946816  ;;  %v2747_v0 = vld [vmem:[#allocation5 + $0xe4] ss:$16 sps:$4 sm:$0xff]   ;;  %v2751_v2 = vld [vmem:[#allocation5 + $0xe0] ss:$16 sps:$4 sm:$0xff]  }
  0x3e   :  { %v2749_v1 = vld [vmem:[#allocation5 + $0x2e4] ss:$16 sps:$4 sm:$0xff]   ;;  %898 = vmatprep.subr.bf16.mxu0 %v2747_v0  ;;  %v2752_v3 = vld [vmem:[#allocation5 + $0x2e0] ss:$16 sps:$4 sm:$0xff]   ;;  %v93_v48 = vld [vmem:[#allocation2 + $0x8] sm:$0xff]  ;;  %s3308_s28 = smov [#allocation11]  }
  0x3f   :  { %939 = vmatprep.subr.bf16.mxu1 %v2749_v1  ;;  %v2753_v4 = vld [vmem:[#allocation5 + $0xc4] ss:$16 sps:$4 sm:$0xff]   ;;  %899 = vmatpush1.bf16.msra.mxu0 %v2751_v2  ;;  %v2757_v6 = vld [vmem:[#allocation5 + $0xc0] ss:$16 sps:$4 sm:$0xff]   ;;  %v2402_v51 = vcombine.high %v93_v48, %v93_v48  ;;  %s2388_s29 = sshll.u32 %s3308_s28, 4  ;;  %s2389_s29 = int_to_ptr.vmem [resolvable:$true] %s2388_s29 }
  0x40   :  { %940 = vmatpush1.bf16.msra.mxu1 %v2752_v3  ;;  %v2755_v5 = vld [vmem:[#allocation5 + $0x2c4] ss:$16 sps:$4 sm:$0xff]   ;;  %900 = vmatprep.subr.bf16.mxu0 %v2753_v4  ;;  %v2758_v7 = vld [vmem:[#allocation5 + $0x2c0] ss:$16 sps:$4 sm:$0xff]   ;;  %v2849_v4 = vld [vmem:[#allocation5 + $0xec] ss:$16 sps:$4 sm:$0xff]   ;;  %p3276_p12 = scmp.lt.s32.totalorder %s2389_s29, %s2389_s29 }
  0x41   :  { %941 = vmatprep.subr.bf16.mxu1 %v2755_v5  ;;  %v2759_v8 = vld [vmem:[#allocation5 + $0xa4] ss:$16 sps:$4 sm:$0xff]   ;;  %v2763_v10 = vld [vmem:[#allocation5 + $0xa0] ss:$16 sps:$4 sm:$0xff]   ;;  %971 = vmatprep.mubr.bf16.mxu1 %v2402_v51  ;;  %v2852_v5 = vld [vmem:[#allocation5 + $0x2ec] ss:$16 sps:$4 sm:$0xff]  }
  0x42   :  { %v2761_v9 = vld [vmem:[#allocation5 + $0x2a4] ss:$16 sps:$4 sm:$0xff]   ;;  %v2764_v11 = vld [vmem:[#allocation5 + $0x2a0] ss:$16 sps:$4 sm:$0xff]   ;;  %s3271_s30 = scalar_lea.vmem %s2389_s29, 128 }
  0x43   :  { %901 = vmatpush1.bf16.msra.mxu0 %v2757_v6  ;;  %v2765_v12 = vld [vmem:[#allocation5 + $0x84] ss:$16 sps:$4 sm:$0xff]   ;;  %v2769_v14 = vld [vmem:[#allocation5 + $0x80] ss:$16 sps:$4 sm:$0xff]   ;;  %p3272_p11 = scmp.ne.s32.totalorder %s2389_s29, %s3271_s30  ;;  %p3277_p13 = scmp.lt.s32.totalorder %s3271_s30, %s3271_s30 }
  0x44   :  { %942 = vmatpush1.bf16.msra.mxu1 %v2758_v7  ;;  %902 = vmatprep.subr.bf16.mxu0 %v2759_v8  ;;  %v2767_v13 = vld [vmem:[#allocation5 + $0x284] ss:$16 sps:$4 sm:$0xff]   ;;  %v2770_v15 = vld [vmem:[#allocation5 + $0x280] ss:$16 sps:$4 sm:$0xff]   ;;  %v3369_v7 = vcombine.low %v93_v48, %v93_v48  ;;  %v2847_v8 = vld [vmem:[#allocation5 + $0xe8] ss:$16 sps:$4 sm:$0xff]  }
  0x45   :  { %943 = vmatprep.subr.bf16.mxu1 %v2761_v9  ;;  %v2771_v16 = vld [vmem:[#allocation5 + $0x64] ss:$16 sps:$4 sm:$0xff]   ;;  %v2775_v18 = vld [vmem:[#allocation5 + $0x60] ss:$16 sps:$4 sm:$0xff]   ;;  %v2850_v9 = vld [vmem:[#allocation5 + $0x2e8] ss:$16 sps:$4 sm:$0xff]   ;;  %p3278_p0 = por %p3277_p13, %p3276_p12 }
  0x46   :  { %v2773_v17 = vld [vmem:[#allocation5 + $0x264] ss:$16 sps:$4 sm:$0xff]   ;;  %v2776_v19 = vld [vmem:[#allocation5 + $0x260] ss:$16 sps:$4 sm:$0xff]   ;;  %v2907_v48 = vld [vmem:[#allocation5 + $0x1a8] ss:$16 sps:$4 sm:$0xff]  }
  0x47   :  { %903 = vmatpush1.bf16.msra.mxu0 %v2763_v10  ;;  %v2777_v20 = vld [vmem:[#allocation5 + $0x44] ss:$16 sps:$4 sm:$0xff]   ;;  %v2781_v22 = vld [vmem:[#allocation5 + $0x40] ss:$16 sps:$4 sm:$0xff]   ;;  %v2855_v10 = vld [vmem:[#allocation5 + $0xcc] ss:$16 sps:$4 sm:$0xff]   ;;  %p3279_p1 = pnand %p3278_p0, %p3272_p11 }
  0x48   :  { %944 = vmatpush1.bf16.msra.mxu1 %v2764_v11  ;;  %904 = vmatprep.subr.bf16.mxu0 %v2765_v12  ;;  %v2779_v21 = vld [vmem:[#allocation5 + $0x244] ss:$16 sps:$4 sm:$0xff]   ;;  %v2782_v23 = vld [vmem:[#allocation5 + $0x240] ss:$16 sps:$4 sm:$0xff]   ;;  %v2858_v11 = vld [vmem:[#allocation5 + $0x2cc] ss:$16 sps:$4 sm:$0xff]  }
  0x49   :  { %945 = vmatprep.subr.bf16.mxu1 %v2767_v13  ;;  %v2783_v24 = vld [vmem:[#allocation5 + $0x24] ss:$16 sps:$4 sm:$0xff]   ;;  %v2787_v26 = vld [vmem:[#allocation5 + $0x20] ss:$16 sps:$4 sm:$0xff]   ;;  %v2853_v12 = vld [vmem:[#allocation5 + $0xc8] ss:$16 sps:$4 sm:$0xff]  }
  0x4a   :  { %v2785_v25 = vld [vmem:[#allocation5 + $0x224] ss:$16 sps:$4 sm:$0xff]   ;;  %v2788_v27 = vld [vmem:[#allocation5 + $0x220] ss:$16 sps:$4 sm:$0xff]   ;;  %v2856_v13 = vld [vmem:[#allocation5 + $0x2c8] ss:$16 sps:$4 sm:$0xff]  }
  0x4b   :  { %905 = vmatpush1.bf16.msra.mxu0 %v2769_v14  ;;  %v2789_v28 = vld [vmem:[#allocation5 + $0x4] ss:$16 sps:$4 sm:$0xff]   ;;  %v2793_v30 = vld [vmem:[#allocation5] ss:$16 sps:$4 sm:$0xff]   ;;  %v2861_v14 = vld [vmem:[#allocation5 + $0xac] ss:$16 sps:$4 sm:$0xff]  }
  0x4c   :  { %946 = vmatpush1.bf16.msra.mxu1 %v2770_v15  ;;  %906 = vmatprep.subr.bf16.mxu0 %v2771_v16  ;;  %v2791_v29 = vld [vmem:[#allocation5 + $0x204] ss:$16 sps:$4 sm:$0xff]   ;;  %v2794_v31 = vld [vmem:[#allocation5 + $0x200] ss:$16 sps:$4 sm:$0xff]   ;;  %v2864_v15 = vld [vmem:[#allocation5 + $0x2ac] ss:$16 sps:$4 sm:$0xff]  }
  0x4d   :  { %947 = vmatprep.subr.bf16.mxu1 %v2773_v17  ;;  %v2795_v32 = vld [vmem:[#allocation5 + $0x1e4] ss:$16 sps:$4 sm:$0xff]   ;;  %v2799_v34 = vld [vmem:[#allocation5 + $0x1e0] ss:$16 sps:$4 sm:$0xff]   ;;  %v2859_v16 = vld [vmem:[#allocation5 + $0xa8] ss:$16 sps:$4 sm:$0xff]  }
  0x4e   :  { %v2797_v33 = vld [vmem:[#allocation5 + $0x3e4] ss:$16 sps:$4 sm:$0xff]   ;;  %v2800_v35 = vld [vmem:[#allocation5 + $0x3e0] ss:$16 sps:$4 sm:$0xff]   ;;  %v2862_v17 = vld [vmem:[#allocation5 + $0x2a8] ss:$16 sps:$4 sm:$0xff]  }
  0x4f   :  { %907 = vmatpush1.bf16.msra.mxu0 %v2775_v18  ;;  %v2801_v36 = vld [vmem:[#allocation5 + $0x1c4] ss:$16 sps:$4 sm:$0xff]   ;;  %v2805_v38 = vld [vmem:[#allocation5 + $0x1c0] ss:$16 sps:$4 sm:$0xff]   ;;  %v2867_v18 = vld [vmem:[#allocation5 + $0x8c] ss:$16 sps:$4 sm:$0xff]  }
  0x50   :  { %948 = vmatpush1.bf16.msra.mxu1 %v2776_v19  ;;  %908 = vmatprep.subr.bf16.mxu0 %v2777_v20  ;;  %v2803_v37 = vld [vmem:[#allocation5 + $0x3c4] ss:$16 sps:$4 sm:$0xff]   ;;  %v2806_v39 = vld [vmem:[#allocation5 + $0x3c0] ss:$16 sps:$4 sm:$0xff]   ;;  %v2870_v19 = vld [vmem:[#allocation5 + $0x28c] ss:$16 sps:$4 sm:$0xff]  }
  0x51   :  { %949 = vmatprep.subr.bf16.mxu1 %v2779_v21  ;;  %v2807_v40 = vld [vmem:[#allocation5 + $0x1a4] ss:$16 sps:$4 sm:$0xff]   ;;  %v2811_v42 = vld [vmem:[#allocation5 + $0x1a0] ss:$16 sps:$4 sm:$0xff]   ;;  %v2865_v20 = vld [vmem:[#allocation5 + $0x88] ss:$16 sps:$4 sm:$0xff]  }
  0x52   :  { %v2809_v41 = vld [vmem:[#allocation5 + $0x3a4] ss:$16 sps:$4 sm:$0xff]   ;;  %v2812_v43 = vld [vmem:[#allocation5 + $0x3a0] ss:$16 sps:$4 sm:$0xff]   ;;  %v2868_v21 = vld [vmem:[#allocation5 + $0x288] ss:$16 sps:$4 sm:$0xff]  }
  0x53   :  { %909 = vmatpush1.bf16.msra.mxu0 %v2781_v22  ;;  %v2813_v44 = vld [vmem:[#allocation5 + $0x184] ss:$16 sps:$4 sm:$0xff]   ;;  %v2817_v49 = vld [vmem:[#allocation5 + $0x180] ss:$16 sps:$4 sm:$0xff]   ;;  %v2873_v22 = vld [vmem:[#allocation5 + $0x6c] ss:$16 sps:$4 sm:$0xff]  }
  0x54   :  { %950 = vmatpush1.bf16.msra.mxu1 %v2782_v23  ;;  %910 = vmatprep.subr.bf16.mxu0 %v2783_v24  ;;  %v2815_v45 = vld [vmem:[#allocation5 + $0x384] ss:$16 sps:$4 sm:$0xff]   ;;  %v2818_v50 = vld [vmem:[#allocation5 + $0x380] ss:$16 sps:$4 sm:$0xff]   ;;  %v2876_v23 = vld [vmem:[#allocation5 + $0x26c] ss:$16 sps:$4 sm:$0xff]  }
  0x55   :  { %951 = vmatprep.subr.bf16.mxu1 %v2785_v25  ;;  %v92_v46 = vld [vmem:[#allocation2] sm:$0xff]  ;;  %v2871_v24 = vld [vmem:[#allocation5 + $0x68] ss:$16 sps:$4 sm:$0xff]  }
  0x56   :  { %v3364_v47 = vcombine.high %v92_v46, %v92_v46  ;;  %v2819_v52 = vld [vmem:[#allocation5 + $0x164] ss:$16 sps:$4 sm:$0xff]   ;;  %v2823_v54 = vld [vmem:[#allocation5 + $0x160] ss:$16 sps:$4 sm:$0xff]   ;;  %v3367_v6 = vcombine.low %v92_v46, %v92_v46  ;;  %v2874_v25 = vld [vmem:[#allocation5 + $0x268] ss:$16 sps:$4 sm:$0xff]  }
  0x57   :  { %911 = vmatpush1.bf16.msra.mxu0 %v2787_v26  ;;  %v2821_v53 = vld [vmem:[#allocation5 + $0x364] ss:$16 sps:$4 sm:$0xff]   ;;  %v2824_v55 = vld [vmem:[#allocation5 + $0x360] ss:$16 sps:$4 sm:$0xff]   ;;  %v2879_v26 = vld [vmem:[#allocation5 + $0x4c] ss:$16 sps:$4 sm:$0xff]  }
  0x58   :  { %952 = vmatpush1.bf16.msra.mxu1 %v2788_v27  ;;  %912 = vmatprep.subr.bf16.mxu0 %v2789_v28  ;;  %v2825_v56 = vld [vmem:[#allocation5 + $0x144] ss:$16 sps:$4 sm:$0xff]   ;;  %v2829_v58 = vld [vmem:[#allocation5 + $0x140] ss:$16 sps:$4 sm:$0xff]   ;;  %v2882_v27 = vld [vmem:[#allocation5 + $0x24c] ss:$16 sps:$4 sm:$0xff]  }
  0x59   :  { %953 = vmatprep.subr.bf16.mxu1 %v2791_v29  ;;  %930 = vmatprep.mubr.bf16.mxu0 %v3364_v47  ;;  %v2827_v57 = vld [vmem:[#allocation5 + $0x344] ss:$16 sps:$4 sm:$0xff]   ;;  %v2830_v59 = vld [vmem:[#allocation5 + $0x340] ss:$16 sps:$4 sm:$0xff]   ;;  %v2877_v28 = vld [vmem:[#allocation5 + $0x48] ss:$16 sps:$4 sm:$0xff]  }
  0x5a   :  { %v2831_v60 = vld [vmem:[#allocation5 + $0x124] ss:$16 sps:$4 sm:$0xff]   ;;  %v2835_v62 = vld [vmem:[#allocation5 + $0x120] ss:$16 sps:$4 sm:$0xff]   ;;  %v2880_v29 = vld [vmem:[#allocation5 + $0x248] ss:$16 sps:$4 sm:$0xff]  }
  0x5b   :  { %913 = vmatpush1.bf16.msra.mxu0 %v2793_v30  ;;  %v2833_v61 = vld [vmem:[#allocation5 + $0x324] ss:$16 sps:$4 sm:$0xff]   ;;  %v2836_v63 = vld [vmem:[#allocation5 + $0x320] ss:$16 sps:$4 sm:$0xff]   ;;  %v2885_v30 = vld [vmem:[#allocation5 + $0x2c] ss:$16 sps:$4 sm:$0xff]  }
  0x5c   :  { %954 = vmatpush1.bf16.msra.mxu1 %v2794_v31  ;;  %914 = vmatprep.subr.bf16.mxu0 %v2795_v32  ;;  %v2837_v0 = vld [vmem:[#allocation5 + $0x104] ss:$16 sps:$4 sm:$0xff]   ;;  %v2841_v2 = vld [vmem:[#allocation5 + $0x100] ss:$16 sps:$4 sm:$0xff]   ;;  %v2888_v31 = vld [vmem:[#allocation5 + $0x22c] ss:$16 sps:$4 sm:$0xff]  }
  0x5d   :  { %955 = vmatprep.subr.bf16.mxu1 %v2797_v33  ;;  %v2839_v1 = vld [vmem:[#allocation5 + $0x304] ss:$16 sps:$4 sm:$0xff]   ;;  %v2842_v3 = vld [vmem:[#allocation5 + $0x300] ss:$16 sps:$4 sm:$0xff]   ;;  %v2883_v32 = vld [vmem:[#allocation5 + $0x28] ss:$16 sps:$4 sm:$0xff]  }
  0x5e   :  { %v2886_v33 = vld [vmem:[#allocation5 + $0x228] ss:$16 sps:$4 sm:$0xff]   ;;  %v2909_v46 = vld [vmem:[#allocation5 + $0x1ac] ss:$16 sps:$4 sm:$0xff]  }
  0x5f   :  { %915 = vmatpush2.bf16.msra.mxu0 %v2799_v34  ;;  %v2891_v34 = vld [vmem:[#allocation5 + $0xc] ss:$16 sps:$4 sm:$0xff]  }
  0x60   :  { %956 = vmatpush2.bf16.msra.mxu1 %v2800_v35  ;;  %916 = vmatprep.subr.bf16.mxu0 %v2801_v36  ;;  %v2894_v35 = vld [vmem:[#allocation5 + $0x20c] ss:$16 sps:$4 sm:$0xff]   ;;  %v2889_v36 = vld [vmem:[#allocation5 + $0x8] ss:$16 sps:$4 sm:$0xff]  }
  0x61   :  { %957 = vmatprep.subr.bf16.mxu1 %v2803_v37  ;;  %v2892_v37 = vld [vmem:[#allocation5 + $0x208] ss:$16 sps:$4 sm:$0xff]  }
  0x63   :  { %917 = vmatpush2.bf16.msra.mxu0 %v2805_v38  ;;  %v2897_v38 = vld [vmem:[#allocation5 + $0x1ec] ss:$16 sps:$4 sm:$0xff]  }
  0x64   :  { %958 = vmatpush2.bf16.msra.mxu1 %v2806_v39  ;;  %918 = vmatprep.subr.bf16.mxu0 %v2807_v40  ;;  %v2900_v39 = vld [vmem:[#allocation5 + $0x3ec] ss:$16 sps:$4 sm:$0xff]   ;;  %v2895_v40 = vld [vmem:[#allocation5 + $0x1e8] ss:$16 sps:$4 sm:$0xff]  }
  0x65   :  { %959 = vmatprep.subr.bf16.mxu1 %v2809_v41  ;;  %v2898_v41 = vld [vmem:[#allocation5 + $0x3e8] ss:$16 sps:$4 sm:$0xff]  }
  0x67   :  { %919 = vmatpush2.bf16.msra.mxu0 %v2811_v42  ;;  %v2903_v42 = vld [vmem:[#allocation5 + $0x1cc] ss:$16 sps:$4 sm:$0xff]  }
  0x68   :  { %960 = vmatpush2.bf16.msra.mxu1 %v2812_v43  ;;  %920 = vmatprep.subr.bf16.mxu0 %v2813_v44  ;;  %v2906_v43 = vld [vmem:[#allocation5 + $0x3cc] ss:$16 sps:$4 sm:$0xff]   ;;  %v2901_v44 = vld [vmem:[#allocation5 + $0x1c8] ss:$16 sps:$4 sm:$0xff]  }
  0x69   :  { %961 = vmatprep.subr.bf16.mxu1 %v2815_v45  ;;  %v2904_v45 = vld [vmem:[#allocation5 + $0x3c8] ss:$16 sps:$4 sm:$0xff]  }
  0x6b   :  { %921 = vmatpush2.bf16.msra.mxu0 %v2817_v49  ;;  %v2910_v49 = vld [vmem:[#allocation5 + $0x3a8] ss:$16 sps:$4 sm:$0xff]  }
  0x6c   :  { %962 = vmatpush2.bf16.msra.mxu1 %v2818_v50  ;;  %922 = vmatprep.subr.bf16.mxu0 %v2819_v52  ;;  %v2915_v50 = vld [vmem:[#allocation5 + $0x18c] ss:$16 sps:$4 sm:$0xff]   ;;  %v2913_v52 = vld [vmem:[#allocation5 + $0x188] ss:$16 sps:$4 sm:$0xff]  }
  0x6d   :  { %963 = vmatprep.subr.bf16.mxu1 %v2821_v53  ;;  %v2916_v53 = vld [vmem:[#allocation5 + $0x388] ss:$16 sps:$4 sm:$0xff]  }
  0x6f   :  { %923 = vmatpush2.bf16.msra.mxu0 %v2823_v54  ;;  %v2921_v54 = vld [vmem:[#allocation5 + $0x16c] ss:$16 sps:$4 sm:$0xff]  }
  0x70   :  { %964 = vmatpush2.bf16.msra.mxu1 %v2824_v55  ;;  %924 = vmatprep.subr.bf16.mxu0 %v2825_v56  ;;  %v2924_v55 = vld [vmem:[#allocation5 + $0x36c] ss:$16 sps:$4 sm:$0xff]   ;;  %v2919_v56 = vld [vmem:[#allocation5 + $0x168] ss:$16 sps:$4 sm:$0xff]  }
  0x71   :  { %965 = vmatprep.subr.bf16.mxu1 %v2827_v57  ;;  %v2922_v57 = vld [vmem:[#allocation5 + $0x368] ss:$16 sps:$4 sm:$0xff]  }
  0x73   :  { %925 = vmatpush2.bf16.msra.mxu0 %v2829_v58  ;;  %v2927_v58 = vld [vmem:[#allocation5 + $0x14c] ss:$16 sps:$4 sm:$0xff]  }
  0x74   :  { %966 = vmatpush2.bf16.msra.mxu1 %v2830_v59  ;;  %926 = vmatprep.subr.bf16.mxu0 %v2831_v60  ;;  %v2930_v59 = vld [vmem:[#allocation5 + $0x34c] ss:$16 sps:$4 sm:$0xff]   ;;  %v2925_v60 = vld [vmem:[#allocation5 + $0x148] ss:$16 sps:$4 sm:$0xff]  }
  0x75   :  { %967 = vmatprep.subr.bf16.mxu1 %v2833_v61  ;;  %v2928_v61 = vld [vmem:[#allocation5 + $0x348] ss:$16 sps:$4 sm:$0xff]  }
  0x77   :  { %927 = vmatpush2.bf16.msra.mxu0 %v2835_v62  ;;  %v2933_v62 = vld [vmem:[#allocation5 + $0x12c] ss:$16 sps:$4 sm:$0xff]  }
  0x78   :  { %968 = vmatpush2.bf16.msra.mxu1 %v2836_v63  ;;  %928 = vmatprep.subr.bf16.mxu0 %v2837_v0  ;;  %v2936_v63 = vld [vmem:[#allocation5 + $0x32c] ss:$16 sps:$4 sm:$0xff]   ;;  %v2931_v0 = vld [vmem:[#allocation5 + $0x128] ss:$16 sps:$4 sm:$0xff]  }
  0x79   :  { %969 = vmatprep.subr.bf16.mxu1 %v2839_v1  ;;  %v2934_v1 = vld [vmem:[#allocation5 + $0x328] ss:$16 sps:$4 sm:$0xff]  }
  0x7b   :  { %929 = vmatpush2.bf16.msra.mxu0 %v2841_v2  ;;  %v2939_v2 = vld [vmem:[#allocation5 + $0x10c] ss:$16 sps:$4 sm:$0xff]  }
  0x7c   :  { %970 = vmatpush2.bf16.msra.mxu1 %v2842_v3  ;;  %980 = vmatprep.subr.bf16.mxu0 %v2849_v4  ;;  %v2942_v3 = vld [vmem:[#allocation5 + $0x30c] ss:$16 sps:$4 sm:$0xff]   ;;  %v2937_v4 = vld [vmem:[#allocation5 + $0x108] ss:$16 sps:$4 sm:$0xff]  }
  0x7d   :  { %1021 = vmatprep.subr.bf16.mxu1 %v2852_v5  ;;  %v2940_v5 = vld [vmem:[#allocation5 + $0x308] ss:$16 sps:$4 sm:$0xff]  }
  0x7e   :  { %931 = vmatmul.mubr.bf16.vlgmr.msra.gmra.mxu0 %v3367_v6 }
  0x7f   :  { %972 = vmatmul.mubr.bf16.vlgmr.msra.gmra.mxu1 %v3369_v7  ;;  %981 = vmatpush1.bf16.msra.mxu0 %v2847_v8  ;;  %v2945_v8 = vld [vmem:[#allocation8 + $0xe4] ss:$16 sps:$4 sm:$0xff]  }
  0x80   :  { %1022 = vmatpush1.bf16.msra.mxu1 %v2850_v9  ;;  %982 = vmatprep.subr.bf16.mxu0 %v2855_v10  ;;  %v2943_v9 = vld [vmem:[#allocation8 + $0xe0] ss:$16 sps:$4 sm:$0xff]   ;;  %v2948_v10 = vld [vmem:[#allocation8 + $0xc4] ss:$16 sps:$4 sm:$0xff]  }
  0x81   :  { %1023 = vmatprep.subr.bf16.mxu1 %v2858_v11  ;;  %1012 = vmatprep.mubr.bf16.mxu0 %v3364_v47  ;;  %v2912_v47 = vld [vmem:[#allocation5 + $0x3ac] ss:$16 sps:$4 sm:$0xff]   ;;  %v2946_v11 = vld [vmem:[#allocation8 + $0xc0] ss:$16 sps:$4 sm:$0xff]  }
  0x82   :  { %1053 = vmatprep.mubr.bf16.mxu1 %v2402_v51  ;;  %v2918_v51 = vld [vmem:[#allocation5 + $0x38c] ss:$16 sps:$4 sm:$0xff]  }
  0x83   :  { %983 = vmatpush1.bf16.msra.mxu0 %v2853_v12  ;;  %v2951_v12 = vld [vmem:[#allocation8 + $0xa4] ss:$16 sps:$4 sm:$0xff]  }
  0x84   :  { %1024 = vmatpush1.bf16.msra.mxu1 %v2856_v13  ;;  %984 = vmatprep.subr.bf16.mxu0 %v2861_v14  ;;  %v2949_v13 = vld [vmem:[#allocation8 + $0xa0] ss:$16 sps:$4 sm:$0xff]   ;;  %v2954_v14 = vld [vmem:[#allocation8 + $0x84] ss:$16 sps:$4 sm:$0xff]  }
  0x85   :  { %1025 = vmatprep.subr.bf16.mxu1 %v2864_v15  ;;  %v2952_v15 = vld [vmem:[#allocation8 + $0x80] ss:$16 sps:$4 sm:$0xff]  }
  0x87   :  { %985 = vmatpush1.bf16.msra.mxu0 %v2859_v16  ;;  %v2993_v16 = vld [vmem:[#allocation8 + $0x2e4] ss:$16 sps:$4 sm:$0xff]  }
  0x88   :  { %1026 = vmatpush1.bf16.msra.mxu1 %v2862_v17  ;;  %986 = vmatprep.subr.bf16.mxu0 %v2867_v18  ;;  %v2957_v17 = vld [vmem:[#allocation8 + $0x64] ss:$16 sps:$4 sm:$0xff]   ;;  %v2991_v18 = vld [vmem:[#allocation8 + $0x2e0] ss:$16 sps:$4 sm:$0xff]  }
  0x89   :  { %1027 = vmatprep.subr.bf16.mxu1 %v2870_v19  ;;  %v2997_v19 = vld [vmem:[#allocation8 + $0x2c0] ss:$16 sps:$4 sm:$0xff]  }
  0x8b   :  { %987 = vmatpush1.bf16.msra.mxu0 %v2865_v20  ;;  %v2960_v20 = vld [vmem:[#allocation8 + $0x44] ss:$16 sps:$4 sm:$0xff]  }
  0x8c   :  { %1028 = vmatpush1.bf16.msra.mxu1 %v2868_v21  ;;  %988 = vmatprep.subr.bf16.mxu0 %v2873_v22  ;;  %v2958_v21 = vld [vmem:[#allocation8 + $0x40] ss:$16 sps:$4 sm:$0xff]  }
  0x8d   :  { %1029 = vmatprep.subr.bf16.mxu1 %v2876_v23  ;;  %v3003_v22 = vld [vmem:[#allocation8 + $0x2a0] ss:$16 sps:$4 sm:$0xff]   ;;  %v3005_v23 = vld [vmem:[#allocation8 + $0x2a4] ss:$16 sps:$4 sm:$0xff]  }
  0x8f   :  { %989 = vmatpush1.bf16.msra.mxu0 %v2871_v24  ;;  %v2963_v24 = vld [vmem:[#allocation8 + $0x24] ss:$16 sps:$4 sm:$0xff]  }
  0x90   :  { %1030 = vmatpush1.bf16.msra.mxu1 %v2874_v25  ;;  %990 = vmatprep.subr.bf16.mxu0 %v2879_v26  ;;  %v2961_v25 = vld [vmem:[#allocation8 + $0x20] ss:$16 sps:$4 sm:$0xff]  }
  0x91   :  { %1031 = vmatprep.subr.bf16.mxu1 %v2882_v27  ;;  %v3009_v26 = vld [vmem:[#allocation8 + $0x280] ss:$16 sps:$4 sm:$0xff]   ;;  %v3011_v27 = vld [vmem:[#allocation8 + $0x284] ss:$16 sps:$4 sm:$0xff]  }
  0x93   :  { %991 = vmatpush1.bf16.msra.mxu0 %v2877_v28  ;;  %v2966_v28 = vld [vmem:[#allocation8 + $0x4] ss:$16 sps:$4 sm:$0xff]  }
  0x94   :  { %1032 = vmatpush1.bf16.msra.mxu1 %v2880_v29  ;;  %992 = vmatprep.subr.bf16.mxu0 %v2885_v30  ;;  %v2964_v29 = vld [vmem:[#allocation8] ss:$16 sps:$4 sm:$0xff]  }
  0x95   :  { %1033 = vmatprep.subr.bf16.mxu1 %v2888_v31  ;;  %v3015_v30 = vld [vmem:[#allocation8 + $0x260] ss:$16 sps:$4 sm:$0xff]   ;;  %v3017_v31 = vld [vmem:[#allocation8 + $0x264] ss:$16 sps:$4 sm:$0xff]  }
  0x97   :  { %993 = vmatpush1.bf16.msra.mxu0 %v2883_v32  ;;  %v2969_v32 = vld [vmem:[#allocation8 + $0x1e4] ss:$16 sps:$4 sm:$0xff]  }
  0x98   :  { %1034 = vmatpush1.bf16.msra.mxu1 %v2886_v33  ;;  %994 = vmatprep.subr.bf16.mxu0 %v2891_v34  ;;  %v2967_v33 = vld [vmem:[#allocation8 + $0x1e0] ss:$16 sps:$4 sm:$0xff]  }
  0x99   :  { %1035 = vmatprep.subr.bf16.mxu1 %v2894_v35  ;;  %v3021_v34 = vld [vmem:[#allocation8 + $0x240] ss:$16 sps:$4 sm:$0xff]   ;;  %v3023_v35 = vld [vmem:[#allocation8 + $0x244] ss:$16 sps:$4 sm:$0xff]  }
  0x9b   :  { %995 = vmatpush1.bf16.msra.mxu0 %v2889_v36  ;;  %v2972_v36 = vld [vmem:[#allocation8 + $0x1c4] ss:$16 sps:$4 sm:$0xff]  }
  0x9c   :  { %1036 = vmatpush1.bf16.msra.mxu1 %v2892_v37  ;;  %996 = vmatprep.subr.bf16.mxu0 %v2897_v38  ;;  %v2970_v37 = vld [vmem:[#allocation8 + $0x1c0] ss:$16 sps:$4 sm:$0xff]  }
  0x9d   :  { %1037 = vmatprep.subr.bf16.mxu1 %v2900_v39  ;;  %v3027_v38 = vld [vmem:[#allocation8 + $0x220] ss:$16 sps:$4 sm:$0xff]   ;;  %v3029_v39 = vld [vmem:[#allocation8 + $0x224] ss:$16 sps:$4 sm:$0xff]  }
  0x9f   :  { %997 = vmatpush2.bf16.msra.mxu0 %v2895_v40  ;;  %v2975_v40 = vld [vmem:[#allocation8 + $0x1a4] ss:$16 sps:$4 sm:$0xff]  }
  0xa0   :  { %1038 = vmatpush2.bf16.msra.mxu1 %v2898_v41  ;;  %998 = vmatprep.subr.bf16.mxu0 %v2903_v42  ;;  %v2973_v41 = vld [vmem:[#allocation8 + $0x1a0] ss:$16 sps:$4 sm:$0xff]  }
  0xa1   :  { %1039 = vmatprep.subr.bf16.mxu1 %v2906_v43  ;;  %v3033_v42 = vld [vmem:[#allocation8 + $0x200] ss:$16 sps:$4 sm:$0xff]   ;;  %v3035_v43 = vld [vmem:[#allocation8 + $0x204] ss:$16 sps:$4 sm:$0xff]  }
  0xa3   :  { %999 = vmatpush2.bf16.msra.mxu0 %v2901_v44  ;;  %v2978_v44 = vld [vmem:[#allocation8 + $0x184] ss:$16 sps:$4 sm:$0xff]  }
  0xa4   :  { %1040 = vmatpush2.bf16.msra.mxu1 %v2904_v45  ;;  %1000 = vmatprep.subr.bf16.mxu0 %v2909_v46  ;;  %v2976_v45 = vld [vmem:[#allocation8 + $0x180] ss:$16 sps:$4 sm:$0xff]  }
  0xa5   :  { %1041 = vmatprep.subr.bf16.mxu1 %v2912_v47  ;;  %v3039_v46 = vld [vmem:[#allocation8 + $0x3e0] ss:$16 sps:$4 sm:$0xff]   ;;  %v3041_v47 = vld [vmem:[#allocation8 + $0x3e4] ss:$16 sps:$4 sm:$0xff]  }
  0xa7   :  { %1001 = vmatpush2.bf16.msra.mxu0 %v2907_v48  ;;  %v2981_v48 = vld [vmem:[#allocation8 + $0x164] ss:$16 sps:$4 sm:$0xff]  }
  0xa8   :  { %1042 = vmatpush2.bf16.msra.mxu1 %v2910_v49  ;;  %1002 = vmatprep.subr.bf16.mxu0 %v2915_v50  ;;  %v2979_v49 = vld [vmem:[#allocation8 + $0x160] ss:$16 sps:$4 sm:$0xff]  }
  0xa9   :  { %1043 = vmatprep.subr.bf16.mxu1 %v2918_v51  ;;  %v3045_v50 = vld [vmem:[#allocation8 + $0x3c0] ss:$16 sps:$4 sm:$0xff]   ;;  %v3047_v51 = vld [vmem:[#allocation8 + $0x3c4] ss:$16 sps:$4 sm:$0xff]  }
  0xab   :  { %1003 = vmatpush2.bf16.msra.mxu0 %v2913_v52  ;;  %v2984_v52 = vld [vmem:[#allocation8 + $0x144] ss:$16 sps:$4 sm:$0xff]  }
  0xac   :  { %1044 = vmatpush2.bf16.msra.mxu1 %v2916_v53  ;;  %1004 = vmatprep.subr.bf16.mxu0 %v2921_v54  ;;  %v2982_v53 = vld [vmem:[#allocation8 + $0x140] ss:$16 sps:$4 sm:$0xff]  }
  0xad   :  { %1045 = vmatprep.subr.bf16.mxu1 %v2924_v55  ;;  %v3051_v54 = vld [vmem:[#allocation8 + $0x3a0] ss:$16 sps:$4 sm:$0xff]   ;;  %v3053_v55 = vld [vmem:[#allocation8 + $0x3a4] ss:$16 sps:$4 sm:$0xff]  }
  0xaf   :  { %1005 = vmatpush2.bf16.msra.mxu0 %v2919_v56  ;;  %v2987_v56 = vld [vmem:[#allocation8 + $0x124] ss:$16 sps:$4 sm:$0xff]  }
  0xb0   :  { %1046 = vmatpush2.bf16.msra.mxu1 %v2922_v57  ;;  %1006 = vmatprep.subr.bf16.mxu0 %v2927_v58  ;;  %v2985_v57 = vld [vmem:[#allocation8 + $0x120] ss:$16 sps:$4 sm:$0xff]  }
  0xb1   :  { %1047 = vmatprep.subr.bf16.mxu1 %v2930_v59  ;;  %v3057_v58 = vld [vmem:[#allocation8 + $0x380] ss:$16 sps:$4 sm:$0xff]   ;;  %v3059_v59 = vld [vmem:[#allocation8 + $0x384] ss:$16 sps:$4 sm:$0xff]  }
  0xb3   :  { %1007 = vmatpush2.bf16.msra.mxu0 %v2925_v60  ;;  %v2990_v60 = vld [vmem:[#allocation8 + $0x104] ss:$16 sps:$4 sm:$0xff]  }
  0xb4   :  { %1048 = vmatpush2.bf16.msra.mxu1 %v2928_v61  ;;  %1008 = vmatprep.subr.bf16.mxu0 %v2933_v62  ;;  %v2988_v61 = vld [vmem:[#allocation8 + $0x100] ss:$16 sps:$4 sm:$0xff]  }
  0xb5   :  { %1049 = vmatprep.subr.bf16.mxu1 %v2936_v63  ;;  %v3063_v62 = vld [vmem:[#allocation8 + $0x360] ss:$16 sps:$4 sm:$0xff]   ;;  %v3065_v63 = vld [vmem:[#allocation8 + $0x364] ss:$16 sps:$4 sm:$0xff]  }
  0xb7   :  { %1009 = vmatpush2.bf16.msra.mxu0 %v2931_v0  ;;  %v2996_v0 = vld [vmem:[#allocation8 + $0xec] ss:$16 sps:$4 sm:$0xff]  }
  0xb8   :  { %1050 = vmatpush2.bf16.msra.mxu1 %v2934_v1  ;;  %1010 = vmatprep.subr.bf16.mxu0 %v2939_v2  ;;  %v3069_v1 = vld [vmem:[#allocation8 + $0x340] ss:$16 sps:$4 sm:$0xff]   ;;  %v3071_v2 = vld [vmem:[#allocation8 + $0x344] ss:$16 sps:$4 sm:$0xff]  }
  0xb9   :  { %1051 = vmatprep.subr.bf16.mxu1 %v2942_v3  ;;  %v3077_v3 = vld [vmem:[#allocation8 + $0x324] ss:$16 sps:$4 sm:$0xff]  }
  0xbb   :  { %1011 = vmatpush2.bf16.msra.mxu0 %v2937_v4  ;;  %v3075_v4 = vld [vmem:[#allocation8 + $0x320] ss:$16 sps:$4 sm:$0xff]  }
  0xbc   :  { %1052 = vmatpush2.bf16.msra.mxu1 %v2940_v5  ;;  %1860 = vmatprep.subr.bf16.mxu0 %v2945_v8  ;;  %v3083_v5 = vld [vmem:[#allocation8 + $0x304] ss:$16 sps:$4 sm:$0xff]   ;;  %v3081_v8 = vld [vmem:[#allocation8 + $0x300] ss:$16 sps:$4 sm:$0xff]  }
  0xbd   :  { %1901 = vmatprep.subr.bf16.mxu1 %v2993_v16 }
  0xbe   :  { %1013 = vmatmul.mubr.bf16.vlgmr.msra.gmra.mxu0 %v3367_v6  ;;  %v2955_v6 = vld [vmem:[#allocation8 + $0x60] ss:$16 sps:$4 sm:$0xff]  }
  0xbf   :  { %1054 = vmatmul.mubr.bf16.vlgmr.msra.gmra.mxu1 %v3369_v7  ;;  %1861 = vmatpush1.bf16.msra.mxu0 %v2943_v9  ;;  %v2999_v7 = vld [vmem:[#allocation8 + $0x2c4] ss:$16 sps:$4 sm:$0xff]   ;;  %v3089_v9 = vld [vmem:[#allocation8 + $0x2ec] ss:$16 sps:$4 sm:$0xff]  }
  0xc0   :  { %1862 = vmatprep.subr.bf16.mxu0 %v2948_v10  ;;  %1902 = vmatpush1.bf16.msra.mxu1 %v2991_v18  ;;  %v224_v10 = vlaneseq }
  0xc1   :  { %1903 = vmatprep.subr.bf16.mxu1 %v2999_v7 }
  0xc3   :  { %1863 = vmatpush1.bf16.msra.mxu0 %v2946_v11  ;;  %v3376_v11 = vshrl.u32 %v224_v10, 7 }
  0xc4   :  { %1864 = vmatprep.subr.bf16.mxu0 %v2951_v12  ;;  %1904 = vmatpush1.bf16.msra.mxu1 %v2997_v19 }
  0xc5   :  { %1905 = vmatprep.subr.bf16.mxu1 %v3005_v23  ;;  %v226_v12 = vsub.s32 0, %v3376_v11 }
  0xc7   :  { %1865 = vmatpush1.bf16.msra.mxu0 %v2949_v13  ;;  %v3379_v13 = vld [vmem:[#allocation7] sm:$0xf] }
  0xc8   :  { %1866 = vmatprep.subr.bf16.mxu0 %v2954_v14  ;;  %1906 = vmatpush1.bf16.msra.mxu1 %v3003_v22  ;;  %v230_v14 = vsub.s32 1, %v3376_v11 }
  0xc9   :  { %1907 = vmatprep.subr.bf16.mxu1 %v3011_v27 }
  0xca   :  { %v231_v16 = vrot.slane %v3379_v13, %v230_v14 }
  0xcb   :  { %1867 = vmatpush1.bf16.msra.mxu0 %v2952_v15  ;;  %v227_v15 = vrot.slane %v3379_v13, %v226_v12 }
  0xcc   :  { %1868 = vmatprep.subr.bf16.mxu0 %v2957_v17  ;;  %1908 = vmatpush1.bf16.msra.mxu1 %v3009_v26 }
  0xcd   :  { %1909 = vmatprep.subr.bf16.mxu1 %v3017_v31 }
  0xcf   :  { %1869 = vmatpush1.bf16.msra.mxu0 %v2955_v6 }
  0xd0   :  { %1870 = vmatprep.subr.bf16.mxu0 %v2960_v20  ;;  %1910 = vmatpush1.bf16.msra.mxu1 %v3015_v30  ;;  %v2994_v30 = vld [vmem:[#allocation8 + $0xe8] ss:$16 sps:$4 sm:$0xff]  }
  0xd1   :  { %1911 = vmatprep.subr.bf16.mxu1 %v3023_v35  ;;  %v3006_v35 = vld [vmem:[#allocation8 + $0xa8] ss:$16 sps:$4 sm:$0xff]  }
  0xd3   :  { %1871 = vmatpush1.bf16.msra.mxu0 %v2958_v21 }
  0xd4   :  { %1872 = vmatprep.subr.bf16.mxu0 %v2963_v24  ;;  %1912 = vmatpush1.bf16.msra.mxu1 %v3021_v34  ;;  %v3008_v34 = vld [vmem:[#allocation8 + $0xac] ss:$16 sps:$4 sm:$0xff]  }
  0xd5   :  { %1913 = vmatprep.subr.bf16.mxu1 %v3029_v39  ;;  %v3018_v39 = vld [vmem:[#allocation8 + $0x68] ss:$16 sps:$4 sm:$0xff]  }
  0xd7   :  { %1873 = vmatpush1.bf16.msra.mxu0 %v2961_v25 }
  0xd8   :  { %1874 = vmatprep.subr.bf16.mxu0 %v2966_v28  ;;  %1914 = vmatpush1.bf16.msra.mxu1 %v3027_v38  ;;  %v3020_v38 = vld [vmem:[#allocation8 + $0x6c] ss:$16 sps:$4 sm:$0xff]  }
  0xd9   :  { %1915 = vmatprep.subr.bf16.mxu1 %v3035_v43  ;;  %v3030_v43 = vld [vmem:[#allocation8 + $0x28] ss:$16 sps:$4 sm:$0xff]  }
  0xdb   :  { %1875 = vmatpush1.bf16.msra.mxu0 %v2964_v29 }
  0xdc   :  { %1876 = vmatprep.subr.bf16.mxu0 %v2969_v32  ;;  %1916 = vmatpush1.bf16.msra.mxu1 %v3033_v42  ;;  %v3002_v32 = vld [vmem:[#allocation8 + $0xcc] ss:$16 sps:$4 sm:$0xff]  }
  0xdd   :  { %1917 = vmatprep.subr.bf16.mxu1 %v3041_v47  ;;  %v3032_v42 = vld [vmem:[#allocation8 + $0x2c] ss:$16 sps:$4 sm:$0xff]   ;;  %v3042_v47 = vld [vmem:[#allocation8 + $0x1e8] ss:$16 sps:$4 sm:$0xff]  }
  0xdf   :  { %1877 = vmatpush2.bf16.msra.mxu0 %v2967_v33  ;;  %v3000_v33 = vld [vmem:[#allocation8 + $0xc8] ss:$16 sps:$4 sm:$0xff]  }
  0xe0   :  { %1878 = vmatprep.subr.bf16.mxu0 %v2972_v36  ;;  %1918 = vmatpush2.bf16.msra.mxu1 %v3039_v46  ;;  %v3014_v36 = vld [vmem:[#allocation8 + $0x8c] ss:$16 sps:$4 sm:$0xff]  }
  0xe1   :  { %1919 = vmatprep.subr.bf16.mxu1 %v3047_v51  ;;  %v3044_v46 = vld [vmem:[#allocation8 + $0x1ec] ss:$16 sps:$4 sm:$0xff]   ;;  %v3054_v51 = vld [vmem:[#allocation8 + $0x1a8] ss:$16 sps:$4 sm:$0xff]  }
  0xe3   :  { %1879 = vmatpush2.bf16.msra.mxu0 %v2970_v37  ;;  %v3012_v37 = vld [vmem:[#allocation8 + $0x88] ss:$16 sps:$4 sm:$0xff]  }
  0xe4   :  { %1880 = vmatprep.subr.bf16.mxu0 %v2975_v40  ;;  %1920 = vmatpush2.bf16.msra.mxu1 %v3045_v50  ;;  %v3026_v40 = vld [vmem:[#allocation8 + $0x4c] ss:$16 sps:$4 sm:$0xff]  }
  0xe5   :  { %1921 = vmatprep.subr.bf16.mxu1 %v3053_v55  ;;  %v3056_v50 = vld [vmem:[#allocation8 + $0x1ac] ss:$16 sps:$4 sm:$0xff]   ;;  %v3066_v55 = vld [vmem:[#allocation8 + $0x168] ss:$16 sps:$4 sm:$0xff]  }
  0xe7   :  { %1881 = vmatpush2.bf16.msra.mxu0 %v2973_v41  ;;  %v3024_v41 = vld [vmem:[#allocation8 + $0x48] ss:$16 sps:$4 sm:$0xff]  }
  0xe8   :  { %1882 = vmatprep.subr.bf16.mxu0 %v2978_v44  ;;  %1922 = vmatpush2.bf16.msra.mxu1 %v3051_v54  ;;  %v3038_v44 = vld [vmem:[#allocation8 + $0xc] ss:$16 sps:$4 sm:$0xff]  }
  0xe9   :  { %1923 = vmatprep.subr.bf16.mxu1 %v3059_v59  ;;  %v3068_v54 = vld [vmem:[#allocation8 + $0x16c] ss:$16 sps:$4 sm:$0xff]   ;;  %v3072_v59 = vld [vmem:[#allocation8 + $0x148] ss:$16 sps:$4 sm:$0xff]  }
  0xeb   :  { %1883 = vmatpush2.bf16.msra.mxu0 %v2976_v45  ;;  %v3036_v45 = vld [vmem:[#allocation8 + $0x8] ss:$16 sps:$4 sm:$0xff]  }
  0xec   :  { %1884 = vmatprep.subr.bf16.mxu0 %v2981_v48  ;;  %1924 = vmatpush2.bf16.msra.mxu1 %v3057_v58  ;;  %v3050_v48 = vld [vmem:[#allocation8 + $0x1cc] ss:$16 sps:$4 sm:$0xff]   ;;  %v238_v58 = vsub.s32 3, %v3376_v11 }
  0xed   :  { %1925 = vmatprep.subr.bf16.mxu1 %v3065_v63 }
  0xef   :  { %1885 = vmatpush2.bf16.msra.mxu0 %v2979_v49  ;;  %v3048_v49 = vld [vmem:[#allocation8 + $0x1c8] ss:$16 sps:$4 sm:$0xff]  }
  0xf0   :  { %1886 = vmatprep.subr.bf16.mxu0 %v2984_v52  ;;  %1926 = vmatpush2.bf16.msra.mxu1 %v3063_v62  ;;  %v3062_v52 = vld [vmem:[#allocation8 + $0x18c] ss:$16 sps:$4 sm:$0xff]   ;;  %v239_v62 = vrot.slane %v3379_v13, %v238_v58 }
  0xf1   :  { %1927 = vmatprep.subr.bf16.mxu1 %v3071_v2  ;;  %v3078_v2 = vld [vmem:[#allocation8 + $0x128] ss:$16 sps:$4 sm:$0xff]  }
  0xf3   :  { %1887 = vmatpush2.bf16.msra.mxu0 %v2982_v53  ;;  %v3060_v53 = vld [vmem:[#allocation8 + $0x188] ss:$16 sps:$4 sm:$0xff]  }
  0xf4   :  { %1888 = vmatprep.subr.bf16.mxu0 %v2987_v56  ;;  %1928 = vmatpush2.bf16.msra.mxu1 %v3069_v1  ;;  %v234_v56 = vsub.s32 2, %v3376_v11 }
  0xf5   :  { %1929 = vmatprep.subr.bf16.mxu1 %v3077_v3 }
  0xf7   :  { %1889 = vmatpush2.bf16.msra.mxu0 %v2985_v57  ;;  %v3074_v57 = vld [vmem:[#allocation8 + $0x14c] ss:$16 sps:$4 sm:$0xff]  }
  0xf8   :  { %1890 = vmatprep.subr.bf16.mxu0 %v2990_v60  ;;  %1930 = vmatpush2.bf16.msra.mxu1 %v3075_v4  ;;  %v235_v60 = vrot.slane %v3379_v13, %v234_v56 }
  0xf9   :  { %1931 = vmatprep.subr.bf16.mxu1 %v3083_v5  ;;  %v3086_v5 = vld [vmem:[#allocation8 + $0x10c] ss:$16 sps:$4 sm:$0xff]  }
  0xfb   :  { %1891 = vmatpush2.bf16.msra.mxu0 %v2988_v61  ;;  %v3080_v61 = vld [vmem:[#allocation8 + $0x12c] ss:$16 sps:$4 sm:$0xff]  }
  0xfc   :  { %1942 = vmatprep.subr.bf16.mxu0 %v2996_v0  ;;  %1932 = vmatpush2.bf16.msra.mxu1 %v3081_v8 }
  0xfd   :  { %1983 = vmatprep.subr.bf16.mxu1 %v3089_v9 }
 0x13e   :  { %v932_v17 = vpop.f32.mrf.mxu0 }
 0x13f   :  { %v973_v18 = vpop.f32.mrf.mxu1  ;;  %v933_v6 = vadd.f32 %v932_v17, %v227_v15  ;;  %v3084_v17 = vld [vmem:[#allocation8 + $0x108] ss:$16 sps:$4 sm:$0xff]  }
 0x140   :  { %v934_v19 = vpop.f32.mrf.mxu0 }
 0x141   :  { %v975_v7 = vpop.f32.mrf.mxu1  ;;  %v974_v20 = vadd.f32 %v973_v18, %v933_v6  ;;  %v935_v21 = vadd.f32 %v934_v19, %v231_v16 }
 0x142   :  { %v936_v22 = vpop.f32.mrf.mxu0 }
 0x143   :  { %v977_v23 = vpop.f32.mrf.mxu1  ;;  %v976_v24 = vadd.f32 %v975_v7, %v935_v21  ;;  %v1062_v25 = vmax.f32 %v974_v20, 0.0  ;;  %v3087_v20 = vld [vmem:[#allocation8 + $0x2e8] ss:$16 sps:$4 sm:$0xff]   ;;  %v3092_v22 = vld [vmem:[#allocation8 + $0x2cc] ss:$16 sps:$4 sm:$0xff]  }
 0x144   :  { %v937_v26 = vpop.f32.mrf.mxu0  ;;  %v3090_v23 = vld [vmem:[#allocation8 + $0x2c8] ss:$16 sps:$4 sm:$0xff]  }
 0x145   :  { %v978_v27 = vpop.f32.mrf.mxu1  ;;  %v1063_v28 = vmax.f32 %v976_v24, 0.0  ;;  %v3388_v31 = vpack.c.bf16 %v1062_v25, %v1062_v25  ;;  %v3095_v24 = vld [vmem:[#allocation8 + $0x2ac] ss:$16 sps:$4 sm:$0xff]   ;;  %v3093_v25 = vld [vmem:[#allocation8 + $0x2a8] ss:$16 sps:$4 sm:$0xff]  }
 0x146   :  { %v3098_v26 = vld [vmem:[#allocation8 + $0x28c] ss:$16 sps:$4 sm:$0xff]  }
 0x147   :  { %v1067_v29 = vpack.c.bf16 %v1063_v28, %v1063_v28  ;;  %v3135_v27 = vld [vmem:[#allocation10 + $0x78] sm:$0xff]  }
 0x148   :  { %v3136_v28 = vld [vmem:[#allocation10 + $0x38] sm:$0xff]  }
 0x149   :  { %1892 = vmatprep.mubr.bf16.mxu0 %v1067_v29 }
 0x14a   :  { %1893 = vmatmul.mubr.bf16.vlgmr.msra.gmra.mxu0 %v3388_v31 }
 0x14b   :  { %1943 = vmatpush1.bf16.msra.mxu0 %v2994_v30  ;;  %1974 = vmatprep.mubr.bf16.mxu0 %v1067_v29  ;;  %v3137_v29 = vld [vmem:[#allocation10 + $0x70] sm:$0xff]   ;;  %v3096_v30 = vld [vmem:[#allocation8 + $0x288] ss:$16 sps:$4 sm:$0xff]  }
 0x14c   :  { %1944 = vmatprep.subr.bf16.mxu0 %v3002_v32  ;;  %v3138_v32 = vld [vmem:[#allocation10 + $0x30] sm:$0xff]  }
 0x14f   :  { %1945 = vmatpush1.bf16.msra.mxu0 %v3000_v33  ;;  %v3139_v33 = vld [vmem:[#allocation10 + $0x68] sm:$0xff]  }
 0x150   :  { %1946 = vmatprep.subr.bf16.mxu0 %v3008_v34  ;;  %v3099_v34 = vld [vmem:[#allocation8 + $0x268] ss:$16 sps:$4 sm:$0xff]  }
 0x153   :  { %1947 = vmatpush1.bf16.msra.mxu0 %v3006_v35  ;;  %v3140_v35 = vld [vmem:[#allocation10 + $0x28] sm:$0xff]  }
 0x154   :  { %1948 = vmatprep.subr.bf16.mxu0 %v3014_v36  ;;  %v3104_v36 = vld [vmem:[#allocation8 + $0x24c] ss:$16 sps:$4 sm:$0xff]  }
 0x157   :  { %1949 = vmatpush1.bf16.msra.mxu0 %v3012_v37  ;;  %v3141_v37 = vld [vmem:[#allocation10 + $0x60] sm:$0xff]  }
 0x158   :  { %1950 = vmatprep.subr.bf16.mxu0 %v3020_v38  ;;  %v3102_v38 = vld [vmem:[#allocation8 + $0x248] ss:$16 sps:$4 sm:$0xff]  }
 0x15b   :  { %1951 = vmatpush1.bf16.msra.mxu0 %v3018_v39  ;;  %v3142_v39 = vld [vmem:[#allocation10 + $0x20] sm:$0xff]  }
 0x15c   :  { %1952 = vmatprep.subr.bf16.mxu0 %v3026_v40  ;;  %v3107_v40 = vld [vmem:[#allocation8 + $0x22c] ss:$16 sps:$4 sm:$0xff]  }
 0x15f   :  { %1953 = vmatpush1.bf16.msra.mxu0 %v3024_v41  ;;  %v3143_v41 = vld [vmem:[#allocation10 + $0x58] sm:$0xff]  }
 0x160   :  { %1954 = vmatprep.subr.bf16.mxu0 %v3032_v42  ;;  %v3105_v42 = vld [vmem:[#allocation8 + $0x228] ss:$16 sps:$4 sm:$0xff]  }
 0x163   :  { %1955 = vmatpush1.bf16.msra.mxu0 %v3030_v43  ;;  %v3144_v43 = vld [vmem:[#allocation10 + $0x18] sm:$0xff]  }
 0x164   :  { %1956 = vmatprep.subr.bf16.mxu0 %v3038_v44  ;;  %v3110_v44 = vld [vmem:[#allocation8 + $0x20c] ss:$16 sps:$4 sm:$0xff]  }
 0x167   :  { %1957 = vmatpush1.bf16.msra.mxu0 %v3036_v45  ;;  %v3145_v45 = vld [vmem:[#allocation10 + $0x50] sm:$0xff]  }
 0x168   :  { %1958 = vmatprep.subr.bf16.mxu0 %v3044_v46  ;;  %v3108_v46 = vld [vmem:[#allocation8 + $0x208] ss:$16 sps:$4 sm:$0xff]  }
 0x16b   :  { %1959 = vmatpush2.bf16.msra.mxu0 %v3042_v47  ;;  %v3113_v47 = vld [vmem:[#allocation8 + $0x3ec] ss:$16 sps:$4 sm:$0xff]  }
 0x16c   :  { %1960 = vmatprep.subr.bf16.mxu0 %v3050_v48  ;;  %v3111_v48 = vld [vmem:[#allocation8 + $0x3e8] ss:$16 sps:$4 sm:$0xff]  }
 0x16f   :  { %1961 = vmatpush2.bf16.msra.mxu0 %v3048_v49  ;;  %v3116_v49 = vld [vmem:[#allocation8 + $0x3cc] ss:$16 sps:$4 sm:$0xff]  }
 0x170   :  { %1962 = vmatprep.subr.bf16.mxu0 %v3056_v50  ;;  %v3114_v50 = vld [vmem:[#allocation8 + $0x3c8] ss:$16 sps:$4 sm:$0xff]  }
 0x173   :  { %1963 = vmatpush2.bf16.msra.mxu0 %v3054_v51  ;;  %v3119_v51 = vld [vmem:[#allocation8 + $0x3ac] ss:$16 sps:$4 sm:$0xff]  }
 0x174   :  { %1964 = vmatprep.subr.bf16.mxu0 %v3062_v52  ;;  %v3117_v52 = vld [vmem:[#allocation8 + $0x3a8] ss:$16 sps:$4 sm:$0xff]  }
 0x177   :  { %1965 = vmatpush2.bf16.msra.mxu0 %v3060_v53  ;;  %v3122_v53 = vld [vmem:[#allocation8 + $0x38c] ss:$16 sps:$4 sm:$0xff]  }
 0x178   :  { %1966 = vmatprep.subr.bf16.mxu0 %v3068_v54  ;;  %v3120_v54 = vld [vmem:[#allocation8 + $0x388] ss:$16 sps:$4 sm:$0xff]  }
 0x17b   :  { %1967 = vmatpush2.bf16.msra.mxu0 %v3066_v55  ;;  %v3125_v55 = vld [vmem:[#allocation8 + $0x36c] ss:$16 sps:$4 sm:$0xff]  }
 0x17c   :  { %1968 = vmatprep.subr.bf16.mxu0 %v3074_v57  ;;  %v3123_v57 = vld [vmem:[#allocation8 + $0x368] ss:$16 sps:$4 sm:$0xff]  }
 0x17e   :  { %v1014_v63 = vpop.f32.mrf.mxu0 }
 0x17f   :  { %v1055_v0 = vpop.f32.mrf.mxu1  ;;  %v1015_v1 = vadd.f32 %v1014_v63, %v235_v60  ;;  %1969 = vmatpush2.bf16.msra.mxu0 %v3072_v59  ;;  %v3128_v59 = vld [vmem:[#allocation8 + $0x34c] ss:$16 sps:$4 sm:$0xff]   ;;  %v3126_v60 = vld [vmem:[#allocation8 + $0x348] ss:$16 sps:$4 sm:$0xff]  }
 0x180   :  { %v1016_v3 = vpop.f32.mrf.mxu0  ;;  %1970 = vmatprep.subr.bf16.mxu0 %v3080_v61  ;;  %v3131_v61 = vld [vmem:[#allocation8 + $0x32c] ss:$16 sps:$4 sm:$0xff]  }
 0x181   :  { %v1057_v4 = vpop.f32.mrf.mxu1  ;;  %v1056_v8 = vadd.f32 %v1055_v0, %v1015_v1  ;;  %v1017_v9 = vadd.f32 %v1016_v3, %v239_v62  ;;  %v3129_v62 = vld [vmem:[#allocation8 + $0x328] ss:$16 sps:$4 sm:$0xff]   ;;  %v3134_v63 = vld [vmem:[#allocation8 + $0x30c] ss:$16 sps:$4 sm:$0xff]   ;;  %v3146_v1 = vld [vmem:[#allocation10 + $0x10] sm:$0xff]  }
 0x182   :  { %v1018_v10 = vpop.f32.mrf.mxu0  ;;  %v3132_v0 = vld [vmem:[#allocation8 + $0x308] ss:$16 sps:$4 sm:$0xff]  }
 0x183   :  { %v1059_v15 = vpop.f32.mrf.mxu1  ;;  %v1058_v16 = vadd.f32 %v1057_v4, %v1017_v9  ;;  %1971 = vmatpush2.bf16.msra.mxu0 %v3078_v2  ;;  %v1064_v18 = vmax.f32 %v1056_v8, 0.0  ;;  %v3147_v2 = vld [vmem:[#allocation10 + $0x48] sm:$0xff]   ;;  %v3149_v4 = vld [vmem:[#allocation10 + $0x40] sm:$0xff]   ;;  %v3151_v8 = vld [vmem:[#allocation10 + $0xf8] sm:$0xff]  }
 0x184   :  { %v1019_v6 = vpop.f32.mrf.mxu0  ;;  %1972 = vmatprep.subr.bf16.mxu0 %v3086_v5  ;;  %v3148_v3 = vld [vmem:[#allocation10 + $0x8] sm:$0xff]   ;;  %v3150_v5 = vld [vmem:[#allocation10] sm:$0xff]   ;;  %v3152_v9 = vld [vmem:[#allocation10 + $0xb8] sm:$0xff]  }
 0x185   :  { %v1060_v19 = vpop.f32.mrf.mxu1  ;;  %v1065_v13 = vmax.f32 %v1058_v16, 0.0  ;;  %v3399_v21 = vpack.c.bf16 %v1064_v18, %v1064_v18  ;;  %v3153_v10 = vld [vmem:[#allocation10 + $0xf0] sm:$0xff]   ;;  %v3155_v16 = vld [vmem:[#allocation10 + $0xe8] sm:$0xff]   ;;  %v3157_v18 = vld [vmem:[#allocation10 + $0xe0] sm:$0xff]  }
 0x186   :  { %v3154_v15 = vld [vmem:[#allocation10 + $0xb0] sm:$0xff]   ;;  %v3158_v6 = vld [vmem:[#allocation10 + $0xa0] sm:$0xff]   ;;  %v3159_v19 = vld [vmem:[#allocation10 + $0xd8] sm:$0xff]  }
 0x187   :  { %v1069_v7 = vpack.c.bf16 %v1065_v13, %v1065_v13  ;;  %1973 = vmatpush2.bf16.msra.mxu0 %v3084_v17  ;;  %v3156_v17 = vld [vmem:[#allocation10 + $0xa8] sm:$0xff]   ;;  %v3160_v13 = vld [vmem:[#allocation10 + $0x98] sm:$0xff]  }
 0x188   :  { %2693 = vmatprep.subr.bf16.mxu0 %v3135_v27  ;;  %v3166_v27 = vld [vmem:[#allocation10 + $0x80] sm:$0xff]  }
 0x189   :  { %1933 = vmatprep.mubr.bf16.mxu1 %v1069_v7 }
 0x18a   :  { %1975 = vmatmul.mubr.bf16.vlgmr.msra.gmra.mxu0 %v3388_v31  ;;  %1934 = vmatmul.mubr.bf16.vlgmr.msra.gmra.mxu1 %v3399_v21  ;;  %v3101_v31 = vld [vmem:[#allocation8 + $0x26c] ss:$16 sps:$4 sm:$0xff]  }
 0x18b   :  { %1984 = vmatpush1.bf16.msra.mxu1 %v3087_v20  ;;  %2015 = vmatprep.mubr.bf16.mxu1 %v1069_v7  ;;  %v3161_v7 = vld [vmem:[#allocation10 + $0xd0] sm:$0xff]  }
 0x18c   :  { %1985 = vmatprep.subr.bf16.mxu1 %v3092_v22  ;;  %2694 = vmatpush3.bf16.msra.mxu0 %v3136_v28  ;;  %v3162_v20 = vld [vmem:[#allocation10 + $0x90] sm:$0xff]   ;;  %v3163_v22 = vld [vmem:[#allocation10 + $0xc8] sm:$0xff]  }
 0x18d   :  { %2695 = vmatprep.subr.bf16.mxu0 %v3137_v29  ;;  %v1198_v29 = vld [vmem:[%s3425_s4] sm:$0xf] }
 0x18f   :  { %1986 = vmatpush1.bf16.msra.mxu1 %v3090_v23  ;;  %v3164_v23 = vld [vmem:[#allocation10 + $0x88] sm:$0xff]  }
 0x190   :  { %1987 = vmatprep.subr.bf16.mxu1 %v3095_v24  ;;  %2696 = vmatpush3.bf16.msra.mxu0 %v3138_v32  ;;  %v1207_v32 = vrot.slane %v1198_v29, %v230_v14  ;;  %v1215_v14 = vrot.slane %v1198_v29, %v238_v58  ;;  %v2659_v58 = vld [vmem:[%s3427_s6] ss:$0 sm:$0xff] }
 0x191   :  { %2697 = vmatprep.subr.bf16.mxu0 %v3139_v33 }
 0x193   :  { %1988 = vmatpush1.bf16.msra.mxu1 %v3093_v25 }
 0x194   :  { %1989 = vmatprep.subr.bf16.mxu1 %v3098_v26  ;;  %2698 = vmatpush3.bf16.msra.mxu0 %v3140_v35  ;;  %v3165_v26 = vld [vmem:[#allocation10 + $0xc0] sm:$0xff]  }
 0x195   :  { %2699 = vmatprep.subr.bf16.mxu0 %v3141_v37 }
 0x197   :  { %1990 = vmatpush1.bf16.msra.mxu1 %v3096_v30  ;;  %v1203_v30 = vrot.slane %v1198_v29, %v226_v12  ;;  %v1211_v12 = vrot.slane %v1198_v29, %v234_v56 }
 0x198   :  { %1991 = vmatprep.subr.bf16.mxu1 %v3101_v31  ;;  %2700 = vmatpush3.bf16.msra.mxu0 %v3142_v39 }
 0x199   :  { %2701 = vmatprep.subr.bf16.mxu0 %v3143_v41 }
 0x19b   :  { %1992 = vmatpush1.bf16.msra.mxu1 %v3099_v34 }
 0x19c   :  { %1993 = vmatprep.subr.bf16.mxu1 %v3104_v36  ;;  %2702 = vmatpush3.bf16.msra.mxu0 %v3144_v43 }
 0x19d   :  { %2703 = vmatprep.subr.bf16.mxu0 %v3145_v45 }
 0x19f   :  { %1994 = vmatpush1.bf16.msra.mxu1 %v3102_v38 }
 0x1a0   :  { %1995 = vmatprep.subr.bf16.mxu1 %v3107_v40  ;;  %2704 = vmatpush3.bf16.msra.mxu0 %v3146_v1 }
 0x1a1   :  { %2705 = vmatprep.subr.bf16.mxu0 %v3147_v2 }
 0x1a3   :  { %1996 = vmatpush1.bf16.msra.mxu1 %v3105_v42 }
 0x1a4   :  { %1997 = vmatprep.subr.bf16.mxu1 %v3110_v44  ;;  %2706 = vmatpush3.bf16.msra.mxu0 %v3148_v3 }
 0x1a5   :  { %2707 = vmatprep.subr.bf16.mxu0 %v3149_v4 }
 0x1a7   :  { %1998 = vmatpush1.bf16.msra.mxu1 %v3108_v46 }
 0x1a8   :  { %1999 = vmatprep.subr.bf16.mxu1 %v3113_v47  ;;  %2708 = vmatpush3.bf16.msra.mxu0 %v3150_v5 }
 0x1ab   :  { %2000 = vmatpush2.bf16.msra.mxu1 %v3111_v48 }
 0x1ac   :  { %2001 = vmatprep.subr.bf16.mxu1 %v3116_v49 }
 0x1af   :  { %2002 = vmatpush2.bf16.msra.mxu1 %v3114_v50 }
 0x1b0   :  { %2003 = vmatprep.subr.bf16.mxu1 %v3119_v51 }
 0x1b3   :  { %2004 = vmatpush2.bf16.msra.mxu1 %v3117_v52 }
 0x1b4   :  { %2005 = vmatprep.subr.bf16.mxu1 %v3122_v53 }
 0x1b7   :  { %2006 = vmatpush2.bf16.msra.mxu1 %v3120_v54 }
 0x1b8   :  { %2007 = vmatprep.subr.bf16.mxu1 %v3125_v55 }
 0x1bb   :  { %2008 = vmatpush2.bf16.msra.mxu1 %v3123_v57 }
 0x1bc   :  { %2009 = vmatprep.subr.bf16.mxu1 %v3128_v59 }
 0x1bf   :  { %2010 = vmatpush2.bf16.msra.mxu1 %v3126_v60 }
 0x1c0   :  { %2011 = vmatprep.subr.bf16.mxu1 %v3131_v61 }
 0x1c3   :  { %2012 = vmatpush2.bf16.msra.mxu1 %v3129_v62 }
 0x1c4   :  { %2013 = vmatprep.subr.bf16.mxu1 %v3134_v63 }
 0x1c7   :  { %2014 = vmatpush2.bf16.msra.mxu1 %v3132_v0 }
 0x1c8   :  { %2715 = vmatprep.subr.bf16.mxu1 %v3151_v8 }
 0x1ca   :  { %2016 = vmatmul.mubr.bf16.vlgmr.msra.gmra.mxu1 %v3399_v21 }
 0x1cb   :  { %2716 = vmatpush3.bf16.msra.mxu1 %v3152_v9 }
 0x1cc   :  { %2717 = vmatprep.subr.bf16.mxu1 %v3153_v10 }
 0x1cf   :  { %2718 = vmatpush3.bf16.msra.mxu1 %v3154_v15 }
 0x1d0   :  { %2719 = vmatprep.subr.bf16.mxu1 %v3155_v16 }
 0x1d3   :  { %2720 = vmatpush3.bf16.msra.mxu1 %v3156_v17 }
 0x1d4   :  { %2721 = vmatprep.subr.bf16.mxu1 %v3157_v18 }
 0x1d7   :  { %2722 = vmatpush3.bf16.msra.mxu1 %v3158_v6 }
 0x1d8   :  { %2723 = vmatprep.subr.bf16.mxu1 %v3159_v19 }
 0x1db   :  { %2724 = vmatpush3.bf16.msra.mxu1 %v3160_v13 }
 0x1dc   :  { %2725 = vmatprep.subr.bf16.mxu1 %v3161_v7 }
 0x1df   :  { %2726 = vmatpush3.bf16.msra.mxu1 %v3162_v20 }
 0x1e0   :  { %2727 = vmatprep.subr.bf16.mxu1 %v3163_v22 }
 0x1e3   :  { %2728 = vmatpush3.bf16.msra.mxu1 %v3164_v23 }
 0x1e4   :  { %2729 = vmatprep.subr.bf16.mxu1 %v3165_v26 }
 0x1e7   :  { %2730 = vmatpush3.bf16.msra.mxu1 %v3166_v27 }
 0x20a   :  { %v1894_v21 = vpop.f32.mrf.mxu0 }
 0x20b   :  { %v1895_v31 = vadd.f32 %v1894_v21, %v1203_v30 }
 0x20c   :  { %v1896_v24 = vpop.f32.mrf.mxu0 }
 0x20d   :  { %v1897_v35 = vadd.f32 %v1896_v24, %v1207_v32 }
 0x20e   :  { %v1898_v25 = vpop.f32.mrf.mxu0 }
 0x210   :  { %v1899_v28 = vpop.f32.mrf.mxu0 }
 0x24a   :  { %v1976_v33 = vpop.f32.mrf.mxu0  ;;  %v1935_v34 = vpop.f32.mrf.mxu1 }
 0x24b   :  { %v1936_v36 = vadd.f32 %v1935_v34, %v1895_v31  ;;  %v1977_v48 = vadd.f32 %v1976_v33, %v1211_v12 }
 0x24c   :  { %v1978_v37 = vpop.f32.mrf.mxu0  ;;  %v1937_v38 = vpop.f32.mrf.mxu1 }
 0x24d   :  { %v1938_v39 = vadd.f32 %v1937_v38, %v1897_v35  ;;  %v2024_v40 = vmax.f32 %v1936_v36, 0.0  ;;  %v1979_v50 = vadd.f32 %v1978_v37, %v1215_v14 }
 0x24e   :  { %v1980_v41 = vpop.f32.mrf.mxu0  ;;  %v1939_v42 = vpop.f32.mrf.mxu1 }
 0x24f   :  { %v2025_v43 = vmax.f32 %v1938_v39, 0.0  ;;  %v2028_v47 = vpack.c.bf16 %v2024_v40, %v2024_v40 }
 0x250   :  { %v1981_v44 = vpop.f32.mrf.mxu0  ;;  %v1940_v45 = vpop.f32.mrf.mxu1 }
 0x251   :  { %v2029_v46 = vpack.c.bf16 %v2025_v43, %v2025_v43 }
 0x253   :  { %2327 = vmatprep.mubr.bf16.mxu0 %v2029_v46 }
 0x254   :  { %2328 = vmatmul.mubr.bf16.vlgmr.msra.gmra.mxu0 %v2028_v47 }
 0x28a   :  { %v2017_v49 = vpop.f32.mrf.mxu1 }
 0x28b   :  { %v2018_v51 = vadd.f32 %v2017_v49, %v1977_v48 }
 0x28c   :  { %v2019_v52 = vpop.f32.mrf.mxu1 }
 0x28d   :  { %v2020_v53 = vadd.f32 %v2019_v52, %v1979_v50  ;;  %v2026_v54 = vmax.f32 %v2018_v51, 0.0 }
 0x28e   :  { %v2021_v55 = vpop.f32.mrf.mxu1 }
 0x28f   :  { %v2027_v57 = vmax.f32 %v2020_v53, 0.0  ;;  %v2030_v61 = vpack.c.bf16 %v2026_v54, %v2026_v54 }
 0x290   :  { %v2022_v59 = vpop.f32.mrf.mxu1 }
 0x291   :  { %v2031_v60 = vpack.c.bf16 %v2027_v57, %v2027_v57 }
 0x293   :  { %2367 = vmatprep.mubr.bf16.mxu1 %v2031_v60 }
 0x294   :  { %2368 = vmatmul.mubr.bf16.vlgmr.msra.gmra.mxu1 %v2030_v61 }
 0x314   :  { %v2709_v62 = vpop.f32.mrf.mxu0 }
 0x316   :  { %v2710_v63 = vpop.f32.mrf.mxu0 }
 0x317   :  { %v2711_v11 = vadd.f32 %v2710_v63, %v2709_v62 }
 0x318   :  { %v2712_v56 = vpop.f32.mrf.mxu0 }
 0x319   :  { %v2330_v3 = vadd.f32 %v2711_v11, %v2659_v58 }
 0x31a   :  { %v2713_v0 = vpop.f32.mrf.mxu0 }
 0x354   :  { %v2731_v1 = vpop.f32.mrf.mxu1 }
 0x356   :  { %v2732_v2 = vpop.f32.mrf.mxu1 }
 0x357   :  { %v2733_v4 = vadd.f32 %v2732_v2, %v2731_v1 }
 0x358   :  { %v2734_v5 = vpop.f32.mrf.mxu1 }
 0x359   :  { %v2370_v8 = vadd.f32 %v2733_v4, %v2330_v3 }
 0x35a   :  { %v2735_v9 = vpop.f32.mrf.mxu1 }
 0x35b   :  { %v2692_v10 = vmul.f32 -1.442695, %v2370_v8 }
 0x35d   :  { %3167 = vpow2.f32 %v2692_v10 }
 0x36a   :  { %v3168_v15 = vpop.eup %3167 }
 0x36b   :  { %v2378_v16 = vadd.f32 1.0, %v3168_v15 }
 0x36d   :  { %3169 = vrcp.f32 %v2378_v16 }
 0x37a   :  { %v3170_v17 = vpop.eup %3169 }
 0x37b   :  { %2381 = vst [vmem:[#allocation11] sm:$0xff] %v3170_v17 }
 0x37c   :  { %3282 = shalt.err (!%p3279_p1)
}
 0x37d   :  { %2391 = dma.vmem_to_hbm [thread:$0]  %s2389_s29, 128, %s3428_s7, [#allocation4]  }
 0x37e   :  { %3297 = dma.done.wait [#allocation4], 128  }
 0x37f   :  { %3298 = vsyncadd [#allocation4], 4294967168 }
 0x380   :  { %2395 = vsyncpa [#allocation3], 1 }
 0x381   :  { %2396 = vsyncpa [#allocation6], 1 }
 0x382   :  { %2397 = vsyncpa [#allocation9], 1 }
 0x383   :  { %2398 = vsyncpa [#allocation4], 1 }

</bundles_post_ra>
